<compile_context>
chip_gen: v6e
topology: v6e:2x2x1
jax: 0.10.0
libtpu: 0.0.40
codegen_flags: <defaults>
</compile_context>

<pallas_src>
import functools
import math

import jax
import jax.numpy as jnp
import numpy as np
from jax.experimental import pallas as pl
from jax.experimental.pallas import tpu as pltpu

EPS = 1e-5


def _round_up(n, m):
    return -(-n // m) * m


def _plan_tiles(H, W, c_max, row_tile=None):
    """Pick the row-tile height TR and the halo block lane width HL.

    TR*W (the tile's flat lane extent) must be a multiple of 128; the halo
    block is the smallest whole number of rows spanning a 128-lane multiple.
    """
    k = 128 // math.gcd(W, 128)        # rows per 128-lane-aligned halo block
    base = max(8, k)                   # TR must be a multiple of this
    if H % base != 0:
        return H, H * W                # fallback: whole image per grid step
    if row_tile is None:
        # budget ~24 MiB for ~12 live tile-sized f32 slabs per grid step
        per_row = 12 * c_max * W * 4
        row_tile = max(base, (24 << 20) // per_row)
    TR = max(base, min(row_tile, H) // base * base)
    while H % TR:
        TR -= base
    HL = k * W if TR < H else TR * W
    return TR, HL


def _conv3x3(x_t, top, bot, w_ref, W):
    """3x3 / stride-1 / pad-1 conv over one row tile as 9 accumulating matmuls.

    x_t: (C, T) activated input tile (T = TR*W, flat row-major spatial).
    top/bot: (C, W) activated halo rows (already zeroed at the image border).
    w_ref: (9, Cout, C) bf16 weights, tap index t = kh*3 + kw.
    Returns the f32 (Cout, T) accumulator.
    """
    C, T = x_t.shape
    Cout = w_ref.shape[1]
    bf16 = jnp.bfloat16

    # hoisted column-border masks (one (1, T) iota reused by every tap)
    colT = jax.lax.broadcasted_iota(jnp.int32, (1, T), 1) % W
    colW = jax.lax.broadcasted_iota(jnp.int32, (1, W), 1)
    mL, mR = colT >= 1, colT <= W - 2
    hL, hR = colW >= 1, colW <= W - 2

    # only 2 expensive full-tile lane rotations (kw = 0 / kw = 2 bases); the
    # row (kh) shifts below are aligned concat splices of these bases.
    xl = jnp.where(mL, pltpu.roll(x_t, 1, 1), 0.0)        # needs col j-1
    xr = jnp.where(mR, pltpu.roll(x_t, T - 1, 1), 0.0)    # needs col j+1
    tl = jnp.where(hL, jnp.roll(top, 1, axis=1), 0.0)
    tr = jnp.where(hR, jnp.roll(top, -1, axis=1), 0.0)
    bl = jnp.where(hL, jnp.roll(bot, 1, axis=1), 0.0)
    br = jnp.where(hR, jnp.roll(bot, -1, axis=1), 0.0)

    acc = jnp.zeros((Cout, T), jnp.float32)

    def mm(acc, t, op):
        return acc + jnp.dot(w_ref[t], op.astype(bf16),
                             preferred_element_type=jnp.float32)

    # kh = 1 (no row shift)
    acc = mm(acc, 3, xl)
    acc = mm(acc, 4, x_t)
    acc = mm(acc, 5, xr)
    # kh = 0 (row above: splice the top halo row in front of the tile)
    acc = mm(acc, 0, jnp.concatenate([tl, xl[:, :T - W]], axis=1))
    acc = mm(acc, 1, jnp.concatenate([top, x_t[:, :T - W]], axis=1))
    acc = mm(acc, 2, jnp.concatenate([tr, xr[:, :T - W]], axis=1))
    # kh = 2 (row below: splice the bottom halo row after the tile)
    acc = mm(acc, 6, jnp.concatenate([xl[:, W:], bl], axis=1))
    acc = mm(acc, 7, jnp.concatenate([x_t[:, W:], bot], axis=1))
    acc = mm(acc, 8, jnp.concatenate([xr[:, W:], br], axis=1))
    return acc


def _conv1_kernel(x_ref, top_ref, bot_ref, w_ref, y_ref, st_ref, *, W):
    r = pl.program_id(1)
    last = pl.num_programs(1) - 1
    HL = top_ref.shape[-1]
    x_t = x_ref[0]                                         # (Cin_p, T) f32
    top = jnp.where(r > 0, top_ref[0, :, HL - W:], 0.0)    # (Cin_p, W)
    bot = jnp.where(r < last, bot_ref[0, :, :W], 0.0)
    acc = _conv3x3(x_t, top, bot, w_ref, W)                # f32 (Cout_p, T)
    y_ref[0] = acc.astype(y_ref.dtype)                     # bf16 storage
    # packed single-pass BN1 per-channel partials (f32, from the f32 acc)
    s = jnp.sum(acc, axis=1, keepdims=True)
    ss = jnp.sum(acc * acc, axis=1, keepdims=True)
    st_ref[0, 0] = jnp.concatenate([s, ss], axis=1)


def _conv2_kernel(a_ref, top_ref, bot_ref, sc_ref, sh_ref, w_ref,
                  o_ref, st_ref, *, W):
    r = pl.program_id(1)
    last = pl.num_programs(1) - 1
    HL = top_ref.shape[-1]
    sc = sc_ref[...]                                       # (Cout_p, 1) f32
    sh = sh_ref[...]
    # fused BN1 (precomputed scale/shift) + ReLU on the tile and its halo rows
    a_t = jnp.maximum(a_ref[0] * sc + sh, 0.0)             # bf16*f32 -> f32
    top = jnp.maximum(top_ref[0, :, HL - W:] * sc + sh, 0.0)
    bot = jnp.maximum(bot_ref[0, :, :W] * sc + sh, 0.0)
    top = jnp.where(r > 0, top, 0.0)                       # border zero-pad is
    bot = jnp.where(r < last, bot, 0.0)                    # post-activation
    acc = _conv3x3(a_t, top, bot, w_ref, W)
    o_ref[0] = acc.astype(o_ref.dtype)
    s = jnp.sum(acc, axis=1, keepdims=True)
    ss = jnp.sum(acc * acc, axis=1, keepdims=True)
    st_ref[0, 0] = jnp.concatenate([s, ss], axis=1)


def double_conv(x_nchw, w1_oihw, g1, b1, w2_oihw, g2, b2, *, row_tile=None):
    """DoubleConv forward (PyTorch training-mode BN semantics), NCHW in/out."""
    N, Cin, H, W = x_nchw.shape
    Cout = w1_oihw.shape[0]
    HW = H * W
    Cin_p = _round_up(Cin, 8)
    Cout_p = _round_up(Cout, 8)

    TR, HL = _plan_tiles(H, W, max(Cin_p, Cout_p), row_tile)
    n_tiles = H // TR
    T = TR * W
    S = T // HL                       # halo blocks per row tile
    n_hblk = HW // HL

    x = x_nchw.astype(jnp.float32).reshape(N, Cin, HW)
    if Cin_p != Cin:
        x = jnp.pad(x, ((0, 0), (0, Cin_p - Cin), (0, 0)))

    def prep_w(w, ci_p):
        co, ci = w.shape[:2]
        w = jnp.pad(w.astype(jnp.float32),
                    ((0, Cout_p - co), (0, ci_p - ci), (0, 0), (0, 0)))
        # (9, Cout_p, ci_p), tap index t = kh*3 + kw; bf16 for the MXU
        return jnp.transpose(w, (2, 3, 0, 1)).reshape(
            9, Cout_p, ci_p).astype(jnp.bfloat16)

    w1_mat = prep_w(w1_oihw, Cin_p)
    w2_mat = prep_w(w2_oihw, Cout_p)

    def pad_vec(v):
        return jnp.pad(v.astype(jnp.float32), (0, Cout_p - Cout))

    # ---- BlockSpecs shared by both conv phases ------------------------------
    def main_spec(c):
        return pl.BlockSpec((1, c, T), lambda n, r: (n, 0, r))

    def top_spec(c):
        return pl.BlockSpec(
            (1, c, HL), lambda n, r: (n, 0, jnp.maximum(r * S - 1, 0)))

    def bot_spec(c):
        return pl.BlockSpec(
            (1, c, HL),
            lambda n, r: (n, 0, jnp.minimum((r + 1) * S, n_hblk - 1)))

    out_spec = pl.BlockSpec((1, Cout_p, T), lambda n, r: (n, 0, r))
    st_spec = pl.BlockSpec((1, 1, Cout_p, 2), lambda n, r: (n, r, 0, 0))
    vec_spec = pl.BlockSpec((Cout_p, 1), lambda n, r: (0, 0))

    out_shapes = [jax.ShapeDtypeStruct((N, Cout_p, HW), jnp.bfloat16),
                  jax.ShapeDtypeStruct((N, n_tiles, Cout_p, 2), jnp.float32)]

    # explicit VMEM budget: double-buffered blocks + ~9 live tile-sized temps
    def vmem_est(ci, in_bytes):
        blocks = (ci * (T + 2 * HL) * in_bytes + Cout_p * T * 2
                  + 9 * Cout_p * ci * 2 + Cout_p * 8)
        return 2 * blocks + 9 * max(ci, Cout_p) * T * 4

    vmem_limit = int(min(64 << 20,
                         max(32 << 20,
                             2 * max(vmem_est(Cin_p, 4), vmem_est(Cout_p, 2)))))
    cparams = pltpu.CompilerParams(
        dimension_semantics=("parallel", "parallel"),
        vmem_limit_bytes=vmem_limit)

    # ---- phase 1: conv1 + packed BN1 partial statistics ----------------------
    mid, st1 = pl.pallas_call(
        functools.partial(_conv1_kernel, W=W),
        grid=(N, n_tiles),
        in_specs=[main_spec(Cin_p), top_spec(Cin_p), bot_spec(Cin_p),
                  pl.BlockSpec((9, Cout_p, Cin_p), lambda n, r: (0, 0, 0))],
        out_specs=[out_spec, st_spec],
        out_shape=out_shapes,
        compiler_params=cparams,
    )(x, x, x, w1_mat)

    # finalize BN1 batch statistics (biased variance over N,H,W) in f32
    cnt = jnp.float32(N * HW)
    sums1 = jnp.sum(st1, axis=(0, 1))                      # (Cout_p, 2)
    mean1 = sums1[:, 0] / cnt
    var1 = jnp.maximum(sums1[:, 1] / cnt - mean1 * mean1, 0.0)
    inv1 = pad_vec(g1) * jax.lax.rsqrt(var1 + EPS)
    scale1 = inv1.reshape(Cout_p, 1)
    shift1 = (pad_vec(b1) - mean1 * inv1).reshape(Cout_p, 1)

    # ---- phase 2: fused BN1-apply + ReLU + conv2 + BN2 partial stats ---------
    out_raw, st2 = pl.pallas_call(
        functools.partial(_conv2_kernel, W=W),
        grid=(N, n_tiles),
        in_specs=[main_spec(Cout_p), top_spec(Cout_p), bot_spec(Cout_p),
                  vec_spec, vec_spec,
                  pl.BlockSpec((9, Cout_p, Cout_p), lambda n, r: (0, 0, 0))],
        out_specs=[out_spec, st_spec],
        out_shape=out_shapes,
        compiler_params=cparams,
    )(mid, mid, mid, scale1, shift1, w2_mat)

    # ---- BN2 finalize + ReLU (needs global conv2 stats; fused XLA pass) ------
    sums2 = jnp.sum(st2, axis=(0, 1))
    mean2 = sums2[:, 0] / cnt
    var2 = jnp.maximum(sums2[:, 1] / cnt - mean2 * mean2, 0.0)
    inv2 = pad_vec(g2) * jax.lax.rsqrt(var2 + EPS)
    out = jnp.maximum(
        out_raw.astype(jnp.float32) * inv2.reshape(1, Cout_p, 1)
        + (pad_vec(b2) - mean2 * inv2).reshape(1, Cout_p, 1), 0.0)
    return out[:, :Cout].reshape(N, Cout, H, W)


def _reference(x_nchw, w1_oihw, g1, b1, w2_oihw, g2, b2):
    """Pure-JAX reference matching PyTorch training-mode DoubleConv."""
    x = jnp.transpose(x_nchw, (0, 2, 3, 1))
    w1 = jnp.transpose(w1_oihw, (2, 3, 1, 0))  # HWIO
    w2 = jnp.transpose(w2_oihw, (2, 3, 1, 0))

    def conv(x, w):
        return jax.lax.conv_general_dilated(
            x, w, window_strides=(1, 1), padding="SAME",
            dimension_numbers=("NHWC", "HWIO", "NHWC"))

    def bn_relu(y, g, b):
        mean = jnp.mean(y, axis=(0, 1, 2), keepdims=True)
        var = jnp.mean((y - mean) ** 2, axis=(0, 1, 2), keepdims=True)
        return jnp.maximum((y - mean) * jax.lax.rsqrt(var + EPS) * g + b, 0.0)

    y = bn_relu(conv(x, w1), g1.reshape(1, 1, 1, -1), b1.reshape(1, 1, 1, -1))
    y = bn_relu(conv(y, w2), g2.reshape(1, 1, 1, -1), b2.reshape(1, 1, 1, -1))
    return jnp.transpose(y, (0, 3, 1, 2))


if __name__ == "__main__":
    N, Cin, Cout, H, W = 2, 4, 8, 16, 16

    key = jax.random.PRNGKey(0)
    kx, kw1, kw2, kg1, kb1, kg2, kb2 = jax.random.split(key, 7)

    x = jax.random.normal(kx, (N, Cin, H, W), jnp.float32)
    # Conv2d weights, PyTorch OIHW layout, bias=False
    w1 = jax.random.normal(kw1, (Cout, Cin, 3, 3), jnp.float32) * 0.2
    w2 = jax.random.normal(kw2, (Cout, Cout, 3, 3), jnp.float32) * 0.2
    # BatchNorm affine params
    g1 = 1.0 + 0.1 * jax.random.normal(kg1, (Cout,), jnp.float32)
    b1 = 0.1 * jax.random.normal(kb1, (Cout,), jnp.float32)
    g2 = 1.0 + 0.1 * jax.random.normal(kg2, (Cout,), jnp.float32)
    b2 = 0.1 * jax.random.normal(kb2, (Cout,), jnp.float32)

    ref = jax.block_until_ready(_reference(x, w1, g1, b1, w2, g2, b2))

    # bf16 MXU operands / bf16 intermediates -> looser tolerance than f32
    TOL = dict(rtol=5e-2, atol=5e-2)

    # spatially tiled path (two 8-row tiles -> exercises the halo splice)
    out = jax.block_until_ready(
        jax.jit(functools.partial(double_conv, row_tile=8))(
            x, w1, g1, b1, w2, g2, b2))
    np.testing.assert_allclose(np.asarray(out), np.asarray(ref), **TOL)

    # auto tile choice (whole image per grid step at this toy size)
    out2 = jax.block_until_ready(
        jax.jit(double_conv)(x, w1, g1, b1, w2, g2, b2))
    np.testing.assert_allclose(np.asarray(out2), np.asarray(ref), **TOL)

    print("KERNEL_OK")
</pallas_src>

<mosaic_0001>
module attributes {stable_mosaic.version = 11 : i64} {
  func.func @_conv1_kernel(%arg0: i32, %arg1: i32, %arg2: memref<1x8x128xf32, #tpu.memory_space<vmem>>, %arg3: memref<1x8x128xf32, #tpu.memory_space<vmem>>, %arg4: memref<1x8x128xf32, #tpu.memory_space<vmem>>, %arg5: memref<9x8x8xbf16, #tpu.memory_space<vmem>>, %arg6: memref<1x8x128xbf16, #tpu.memory_space<vmem>>, %arg7: memref<1x1x8x2xf32, #tpu.memory_space<vmem>>) attributes {dimension_semantics = [#tpu.dimension_semantics<parallel>, #tpu.dimension_semantics<parallel>], iteration_bounds = array<i64: 2, 2>, scalar_prefetch = 0 : i64, scratch_operands = 0 : i64, tpu.core_type = #tpu.core_type<tc>, window_params = [{transform_indices = @transform_0, window_bounds = array<i64: 1, 8, 128>}, {transform_indices = @transform_1, window_bounds = array<i64: 1, 8, 128>}, {transform_indices = @transform_2, window_bounds = array<i64: 1, 8, 128>}, {pipeline_mode = #tpu.pipeline_mode<synchronous>, transform_indices = @transform_3, window_bounds = array<i64: 9, 8, 8>}, {transform_indices = @transform_4, window_bounds = array<i64: 1, 8, 128>}, {transform_indices = @transform_5, window_bounds = array<i64: 1, 1, 8, 2>}]} {
    %c0 = arith.constant 0 : index
    %c0_0 = arith.constant 0 : index
    %c0_1 = arith.constant 0 : index
    %0 = vector.load %arg2[%c0, %c0_0, %c0_1] : memref<1x8x128xf32, #tpu.memory_space<vmem>>, vector<1x8x128xf32>
    %1 = vector.shape_cast %0 : vector<1x8x128xf32> to vector<8x128xf32>
    %c0_i32 = arith.constant 0 : i32
    %2 = arith.cmpi sgt, %arg1, %c0_i32 : i32
    %c0_2 = arith.constant 0 : index
    %c0_3 = arith.constant 0 : index
    %c112 = arith.constant 112 : index
    %3 = vector.load %arg3[%c0_2, %c0_3, %c112] : memref<1x8x128xf32, #tpu.memory_space<vmem>>, vector<1x8x16xf32>
    %4 = vector.shape_cast %3 : vector<1x8x16xf32> to vector<8x16xf32>
    %cst = arith.constant 0.000000e+00 : f32
    %5 = vector.broadcast %cst : f32 to vector<8x16xf32>
    %6 = arith.select %2, %4, %5 : vector<8x16xf32>
    %c1_i32 = arith.constant 1 : i32
    %7 = arith.cmpi slt, %arg1, %c1_i32 : i32
    %c0_4 = arith.constant 0 : index
    %c0_5 = arith.constant 0 : index
    %c0_6 = arith.constant 0 : index
    %8 = vector.load %arg4[%c0_4, %c0_5, %c0_6] : memref<1x8x128xf32, #tpu.memory_space<vmem>>, vector<1x8x16xf32>
    %9 = vector.shape_cast %8 : vector<1x8x16xf32> to vector<8x16xf32>
    %cst_7 = arith.constant 0.000000e+00 : f32
    %10 = vector.broadcast %cst_7 : f32 to vector<8x16xf32>
    %11 = arith.select %7, %9, %10 : vector<8x16xf32>
    %12 = tpu.iota {dimensions = array<i32: 1>} : vector<1x128xi32>
    %c16_i32 = arith.constant 16 : i32
    %c0_i32_8 = arith.constant 0 : i32
    %13 = arith.cmpi eq, %c16_i32, %c0_i32_8 : i32
    %c1_i32_9 = arith.constant 1 : i32
    %14 = arith.select %13, %c1_i32_9, %c16_i32 : i32
    %15 = vector.broadcast %14 : i32 to vector<1x128xi32>
    %16 = arith.remsi %12, %15 : vector<1x128xi32>
    %c0_i32_10 = arith.constant 0 : i32
    %17 = vector.broadcast %c0_i32_10 : i32 to vector<1x128xi32>
    %18 = arith.cmpi ne, %16, %17 : vector<1x128xi32>
    %c0_i32_11 = arith.constant 0 : i32
    %19 = vector.broadcast %c0_i32_11 : i32 to vector<1x128xi32>
    %20 = arith.cmpi slt, %16, %19 : vector<1x128xi32>
    %c0_i32_12 = arith.constant 0 : i32
    %21 = arith.cmpi slt, %14, %c0_i32_12 : i32
    %22 = vector.broadcast %21 : i1 to vector<1x128xi1>
    %23 = vector.broadcast %22 : vector<1x128xi1> to vector<1x128xi1>
    %24 = arith.xori %20, %23 : vector<1x128xi1>
    %25 = arith.andi %24, %18 : vector<1x128xi1>
    %26 = vector.broadcast %14 : i32 to vector<1x128xi32>
    %27 = arith.addi %16, %26 : vector<1x128xi32>
    %28 = arith.select %25, %27, %16 : vector<1x128xi1>, vector<1x128xi32>
    %29 = tpu.iota {dimensions = array<i32: 1>} : vector<1x16xi32>
    %c1_i32_13 = arith.constant 1 : i32
    %30 = vector.broadcast %c1_i32_13 : i32 to vector<1x128xi32>
    %31 = arith.cmpi sge, %28, %30 : vector<1x128xi32>
    %c14_i32 = arith.constant 14 : i32
    %32 = vector.broadcast %c14_i32 : i32 to vector<1x128xi32>
    %33 = arith.cmpi sle, %28, %32 : vector<1x128xi32>
    %c1_i32_14 = arith.constant 1 : i32
    %34 = vector.broadcast %c1_i32_14 : i32 to vector<1x16xi32>
    %35 = arith.cmpi sge, %29, %34 : vector<1x16xi32>
    %c14_i32_15 = arith.constant 14 : i32
    %36 = vector.broadcast %c14_i32_15 : i32 to vector<1x16xi32>
    %37 = arith.cmpi sle, %29, %36 : vector<1x16xi32>
    %c1_i32_16 = arith.constant 1 : i32
    %38 = tpu.dynamic_rotate %1 by %c1_i32_16 dim 1 : vector<8x128xf32>, i32 -> vector<8x128xf32>
    %cst_17 = arith.constant 0.000000e+00 : f32
    %39 = vector.shape_cast %31 : vector<1x128xi1> to vector<1x128xi1>
    %40 = vector.broadcast %39 : vector<1x128xi1> to vector<8x128xi1>
    %41 = vector.broadcast %cst_17 : f32 to vector<8x128xf32>
    %42 = arith.select %40, %38, %41 : vector<8x128xi1>, vector<8x128xf32>
    %c127_i32 = arith.constant 127 : i32
    %43 = tpu.dynamic_rotate %1 by %c127_i32 dim 1 : vector<8x128xf32>, i32 -> vector<8x128xf32>
    %cst_18 = arith.constant 0.000000e+00 : f32
    %44 = vector.shape_cast %33 : vector<1x128xi1> to vector<1x128xi1>
    %45 = vector.broadcast %44 : vector<1x128xi1> to vector<8x128xi1>
    %46 = vector.broadcast %cst_18 : f32 to vector<8x128xf32>
    %47 = arith.select %45, %43, %46 : vector<8x128xi1>, vector<8x128xf32>
    %48 = vector.extract_strided_slice %6 {offsets = [0, 15], sizes = [8, 1], strides = [1, 1]} : vector<8x16xf32> to vector<8x1xf32>
    %49 = vector.extract_strided_slice %6 {offsets = [0, 0], sizes = [8, 15], strides = [1, 1]} : vector<8x16xf32> to vector<8x15xf32>
    %50 = tpu.concatenate %48, %49 in 1 : vector<8x1xf32>, vector<8x15xf32> -> vector<8x16xf32>
    %cst_19 = arith.constant 0.000000e+00 : f32
    %51 = vector.shape_cast %35 : vector<1x16xi1> to vector<1x16xi1>
    %52 = vector.broadcast %51 : vector<1x16xi1> to vector<8x16xi1>
    %53 = vector.broadcast %cst_19 : f32 to vector<8x16xf32>
    %54 = arith.select %52, %50, %53 : vector<8x16xi1>, vector<8x16xf32>
    %55 = vector.extract_strided_slice %6 {offsets = [0, 1], sizes = [8, 15], strides = [1, 1]} : vector<8x16xf32> to vector<8x15xf32>
    %56 = vector.extract_strided_slice %6 {offsets = [0, 0], sizes = [8, 1], strides = [1, 1]} : vector<8x16xf32> to vector<8x1xf32>
    %57 = tpu.concatenate %55, %56 in 1 : vector<8x15xf32>, vector<8x1xf32> -> vector<8x16xf32>
    %cst_20 = arith.constant 0.000000e+00 : f32
    %58 = vector.shape_cast %37 : vector<1x16xi1> to vector<1x16xi1>
    %59 = vector.broadcast %58 : vector<1x16xi1> to vector<8x16xi1>
    %60 = vector.broadcast %cst_20 : f32 to vector<8x16xf32>
    %61 = arith.select %59, %57, %60 : vector<8x16xi1>, vector<8x16xf32>
    %62 = vector.extract_strided_slice %11 {offsets = [0, 15], sizes = [8, 1], strides = [1, 1]} : vector<8x16xf32> to vector<8x1xf32>
    %63 = vector.extract_strided_slice %11 {offsets = [0, 0], sizes = [8, 15], strides = [1, 1]} : vector<8x16xf32> to vector<8x15xf32>
    %64 = tpu.concatenate %62, %63 in 1 : vector<8x1xf32>, vector<8x15xf32> -> vector<8x16xf32>
    %cst_21 = arith.constant 0.000000e+00 : f32
    %65 = vector.shape_cast %35 : vector<1x16xi1> to vector<1x16xi1>
    %66 = vector.broadcast %65 : vector<1x16xi1> to vector<8x16xi1>
    %67 = vector.broadcast %cst_21 : f32 to vector<8x16xf32>
    %68 = arith.select %66, %64, %67 : vector<8x16xi1>, vector<8x16xf32>
    %69 = vector.extract_strided_slice %11 {offsets = [0, 1], sizes = [8, 15], strides = [1, 1]} : vector<8x16xf32> to vector<8x15xf32>
    %70 = vector.extract_strided_slice %11 {offsets = [0, 0], sizes = [8, 1], strides = [1, 1]} : vector<8x16xf32> to vector<8x1xf32>
    %71 = tpu.concatenate %69, %70 in 1 : vector<8x15xf32>, vector<8x1xf32> -> vector<8x16xf32>
    %cst_22 = arith.constant 0.000000e+00 : f32
    %72 = vector.shape_cast %37 : vector<1x16xi1> to vector<1x16xi1>
    %73 = vector.broadcast %72 : vector<1x16xi1> to vector<8x16xi1>
    %74 = vector.broadcast %cst_22 : f32 to vector<8x16xf32>
    %75 = arith.select %73, %71, %74 : vector<8x16xi1>, vector<8x16xf32>
    %cst_23 = arith.constant 0.000000e+00 : f32
    %76 = vector.broadcast %cst_23 : f32 to vector<8x128xf32>
    %c3 = arith.constant 3 : index
    %c0_24 = arith.constant 0 : index
    %c0_25 = arith.constant 0 : index
    %77 = vector.load %arg5[%c3, %c0_24, %c0_25] : memref<9x8x8xbf16, #tpu.memory_space<vmem>>, vector<1x8x8xbf16>
    %78 = vector.shape_cast %77 : vector<1x8x8xbf16> to vector<8x8xbf16>
    %79 = arith.truncf %42 : vector<8x128xf32> to vector<8x128xbf16>
    %cst_26 = arith.constant dense<0.000000e+00> : vector<8x128xf32>
    %80 = tpu.matmul %78, %79, %cst_26 {dimension_numbers = #tpu.dot_dimension_numbers<[1], [0], [0], [1], [0, 0, 1, 1], [], []>} : vector<8x8xbf16>, vector<8x128xbf16>, vector<8x128xf32> -> vector<8x128xf32>
    %81 = arith.addf %76, %80 : vector<8x128xf32>
    %c4 = arith.constant 4 : index
    %c0_27 = arith.constant 0 : index
    %c0_28 = arith.constant 0 : index
    %82 = vector.load %arg5[%c4, %c0_27, %c0_28] : memref<9x8x8xbf16, #tpu.memory_space<vmem>>, vector<1x8x8xbf16>
    %83 = vector.shape_cast %82 : vector<1x8x8xbf16> to vector<8x8xbf16>
    %84 = arith.truncf %1 : vector<8x128xf32> to vector<8x128xbf16>
    %cst_29 = arith.constant dense<0.000000e+00> : vector<8x128xf32>
    %85 = tpu.matmul %83, %84, %cst_29 {dimension_numbers = #tpu.dot_dimension_numbers<[1], [0], [0], [1], [0, 0, 1, 1], [], []>} : vector<8x8xbf16>, vector<8x128xbf16>, vector<8x128xf32> -> vector<8x128xf32>
    %86 = arith.addf %81, %85 : vector<8x128xf32>
    %c5 = arith.constant 5 : index
    %c0_30 = arith.constant 0 : index
    %c0_31 = arith.constant 0 : index
    %87 = vector.load %arg5[%c5, %c0_30, %c0_31] : memref<9x8x8xbf16, #tpu.memory_space<vmem>>, vector<1x8x8xbf16>
    %88 = vector.shape_cast %87 : vector<1x8x8xbf16> to vector<8x8xbf16>
    %89 = arith.truncf %47 : vector<8x128xf32> to vector<8x128xbf16>
    %cst_32 = arith.constant dense<0.000000e+00> : vector<8x128xf32>
    %90 = tpu.matmul %88, %89, %cst_32 {dimension_numbers = #tpu.dot_dimension_numbers<[1], [0], [0], [1], [0, 0, 1, 1], [], []>} : vector<8x8xbf16>, vector<8x128xbf16>, vector<8x128xf32> -> vector<8x128xf32>
    %91 = arith.addf %86, %90 : vector<8x128xf32>
    %92 = vector.extract_strided_slice %42 {offsets = [0, 0], sizes = [8, 112], strides = [1, 1]} : vector<8x128xf32> to vector<8x112xf32>
    %93 = tpu.concatenate %54, %92 in 1 : vector<8x16xf32>, vector<8x112xf32> -> vector<8x128xf32>
    %c0_33 = arith.constant 0 : index
    %c0_34 = arith.constant 0 : index
    %c0_35 = arith.constant 0 : index
    %94 = vector.load %arg5[%c0_33, %c0_34, %c0_35] : memref<9x8x8xbf16, #tpu.memory_space<vmem>>, vector<1x8x8xbf16>
    %95 = vector.shape_cast %94 : vector<1x8x8xbf16> to vector<8x8xbf16>
    %96 = arith.truncf %93 : vector<8x128xf32> to vector<8x128xbf16>
    %cst_36 = arith.constant dense<0.000000e+00> : vector<8x128xf32>
    %97 = tpu.matmul %95, %96, %cst_36 {dimension_numbers = #tpu.dot_dimension_numbers<[1], [0], [0], [1], [0, 0, 1, 1], [], []>} : vector<8x8xbf16>, vector<8x128xbf16>, vector<8x128xf32> -> vector<8x128xf32>
    %98 = arith.addf %91, %97 : vector<8x128xf32>
    %99 = vector.extract_strided_slice %1 {offsets = [0, 0], sizes = [8, 112], strides = [1, 1]} : vector<8x128xf32> to vector<8x112xf32>
    %100 = tpu.concatenate %6, %99 in 1 : vector<8x16xf32>, vector<8x112xf32> -> vector<8x128xf32>
    %c1 = arith.constant 1 : index
    %c0_37 = arith.constant 0 : index
    %c0_38 = arith.constant 0 : index
    %101 = vector.load %arg5[%c1, %c0_37, %c0_38] : memref<9x8x8xbf16, #tpu.memory_space<vmem>>, vector<1x8x8xbf16>
    %102 = vector.shape_cast %101 : vector<1x8x8xbf16> to vector<8x8xbf16>
    %103 = arith.truncf %100 : vector<8x128xf32> to vector<8x128xbf16>
    %cst_39 = arith.constant dense<0.000000e+00> : vector<8x128xf32>
    %104 = tpu.matmul %102, %103, %cst_39 {dimension_numbers = #tpu.dot_dimension_numbers<[1], [0], [0], [1], [0, 0, 1, 1], [], []>} : vector<8x8xbf16>, vector<8x128xbf16>, vector<8x128xf32> -> vector<8x128xf32>
    %105 = arith.addf %98, %104 : vector<8x128xf32>
    %106 = vector.extract_strided_slice %47 {offsets = [0, 0], sizes = [8, 112], strides = [1, 1]} : vector<8x128xf32> to vector<8x112xf32>
    %107 = tpu.concatenate %61, %106 in 1 : vector<8x16xf32>, vector<8x112xf32> -> vector<8x128xf32>
    %c2 = arith.constant 2 : index
    %c0_40 = arith.constant 0 : index
    %c0_41 = arith.constant 0 : index
    %108 = vector.load %arg5[%c2, %c0_40, %c0_41] : memref<9x8x8xbf16, #tpu.memory_space<vmem>>, vector<1x8x8xbf16>
    %109 = vector.shape_cast %108 : vector<1x8x8xbf16> to vector<8x8xbf16>
    %110 = arith.truncf %107 : vector<8x128xf32> to vector<8x128xbf16>
    %cst_42 = arith.constant dense<0.000000e+00> : vector<8x128xf32>
    %111 = tpu.matmul %109, %110, %cst_42 {dimension_numbers = #tpu.dot_dimension_numbers<[1], [0], [0], [1], [0, 0, 1, 1], [], []>} : vector<8x8xbf16>, vector<8x128xbf16>, vector<8x128xf32> -> vector<8x128xf32>
    %112 = arith.addf %105, %111 : vector<8x128xf32>
    %113 = vector.extract_strided_slice %42 {offsets = [0, 16], sizes = [8, 112], strides = [1, 1]} : vector<8x128xf32> to vector<8x112xf32>
    %114 = tpu.concatenate %113, %68 in 1 : vector<8x112xf32>, vector<8x16xf32> -> vector<8x128xf32>
    %c6 = arith.constant 6 : index
    %c0_43 = arith.constant 0 : index
    %c0_44 = arith.constant 0 : index
    %115 = vector.load %arg5[%c6, %c0_43, %c0_44] : memref<9x8x8xbf16, #tpu.memory_space<vmem>>, vector<1x8x8xbf16>
    %116 = vector.shape_cast %115 : vector<1x8x8xbf16> to vector<8x8xbf16>
    %117 = arith.truncf %114 : vector<8x128xf32> to vector<8x128xbf16>
    %cst_45 = arith.constant dense<0.000000e+00> : vector<8x128xf32>
    %118 = tpu.matmul %116, %117, %cst_45 {dimension_numbers = #tpu.dot_dimension_numbers<[1], [0], [0], [1], [0, 0, 1, 1], [], []>} : vector<8x8xbf16>, vector<8x128xbf16>, vector<8x128xf32> -> vector<8x128xf32>
    %119 = arith.addf %112, %118 : vector<8x128xf32>
    %120 = vector.extract_strided_slice %1 {offsets = [0, 16], sizes = [8, 112], strides = [1, 1]} : vector<8x128xf32> to vector<8x112xf32>
    %121 = tpu.concatenate %120, %11 in 1 : vector<8x112xf32>, vector<8x16xf32> -> vector<8x128xf32>
    %c7 = arith.constant 7 : index
    %c0_46 = arith.constant 0 : index
    %c0_47 = arith.constant 0 : index
    %122 = vector.load %arg5[%c7, %c0_46, %c0_47] : memref<9x8x8xbf16, #tpu.memory_space<vmem>>, vector<1x8x8xbf16>
    %123 = vector.shape_cast %122 : vector<1x8x8xbf16> to vector<8x8xbf16>
    %124 = arith.truncf %121 : vector<8x128xf32> to vector<8x128xbf16>
    %cst_48 = arith.constant dense<0.000000e+00> : vector<8x128xf32>
    %125 = tpu.matmul %123, %124, %cst_48 {dimension_numbers = #tpu.dot_dimension_numbers<[1], [0], [0], [1], [0, 0, 1, 1], [], []>} : vector<8x8xbf16>, vector<8x128xbf16>, vector<8x128xf32> -> vector<8x128xf32>
    %126 = arith.addf %119, %125 : vector<8x128xf32>
    %127 = vector.extract_strided_slice %47 {offsets = [0, 16], sizes = [8, 112], strides = [1, 1]} : vector<8x128xf32> to vector<8x112xf32>
    %128 = tpu.concatenate %127, %75 in 1 : vector<8x112xf32>, vector<8x16xf32> -> vector<8x128xf32>
    %c8 = arith.constant 8 : index
    %c0_49 = arith.constant 0 : index
    %c0_50 = arith.constant 0 : index
    %129 = vector.load %arg5[%c8, %c0_49, %c0_50] : memref<9x8x8xbf16, #tpu.memory_space<vmem>>, vector<1x8x8xbf16>
    %130 = vector.shape_cast %129 : vector<1x8x8xbf16> to vector<8x8xbf16>
    %131 = arith.truncf %128 : vector<8x128xf32> to vector<8x128xbf16>
    %cst_51 = arith.constant dense<0.000000e+00> : vector<8x128xf32>
    %132 = tpu.matmul %130, %131, %cst_51 {dimension_numbers = #tpu.dot_dimension_numbers<[1], [0], [0], [1], [0, 0, 1, 1], [], []>} : vector<8x8xbf16>, vector<8x128xbf16>, vector<8x128xf32> -> vector<8x128xf32>
    %133 = arith.addf %126, %132 : vector<8x128xf32>
    %134 = arith.truncf %133 : vector<8x128xf32> to vector<8x128xbf16>
    %c0_52 = arith.constant 0 : index
    %c0_53 = arith.constant 0 : index
    %c0_54 = arith.constant 0 : index
    %135 = vector.load %arg6[%c0_52, %c0_53, %c0_54] : memref<1x8x128xbf16, #tpu.memory_space<vmem>>, vector<1x8x128xbf16>
    %136 = vector.shape_cast %135 : vector<1x8x128xbf16> to vector<8x128xbf16>
    %137 = vector.shape_cast %134 : vector<8x128xbf16> to vector<1x8x128xbf16>
    tpu.vector_store %arg6[%c0_52, %c0_53, %c0_54], %137 {strides = array<i32>} : memref<1x8x128xbf16, #tpu.memory_space<vmem>>, vector<1x8x128xbf16>,
    %cst_55 = arith.constant dense<0.000000e+00> : vector<8xf32>
    %138 = vector.multi_reduction <add>, %133, %cst_55 [1] : vector<8x128xf32> to vector<8xf32>
    %139 = vector.shape_cast %138 : vector<8xf32> to vector<8x1xf32>
    %140 = arith.mulf %133, %133 : vector<8x128xf32>
    %cst_56 = arith.constant dense<0.000000e+00> : vector<8xf32>
    %141 = vector.multi_reduction <add>, %140, %cst_56 [1] : vector<8x128xf32> to vector<8xf32>
    %142 = vector.shape_cast %141 : vector<8xf32> to vector<8x1xf32>
    %143 = tpu.concatenate %139, %142 in 1 : vector<8x1xf32>, vector<8x1xf32> -> vector<8x2xf32>
    %c0_57 = arith.constant 0 : index
    %c0_58 = arith.constant 0 : index
    %c0_59 = arith.constant 0 : index
    %c0_60 = arith.constant 0 : index
    %144 = vector.load %arg7[%c0_57, %c0_58, %c0_59, %c0_60] : memref<1x1x8x2xf32, #tpu.memory_space<vmem>>, vector<1x1x8x2xf32>
    %145 = vector.shape_cast %144 : vector<1x1x8x2xf32> to vector<8x2xf32>
    %146 = vector.shape_cast %143 : vector<8x2xf32> to vector<1x1x8x2xf32>
    tpu.vector_store %arg7[%c0_57, %c0_58, %c0_59, %c0_60], %146 {strides = array<i32>} : memref<1x1x8x2xf32, #tpu.memory_space<vmem>>, vector<1x1x8x2xf32>,
    return
  }
  func.func @transform_0(%arg0: i32, %arg1: i32) -> (i32, i32, i32) {
    %c0_i32 = arith.constant 0 : i32
    %c0_i32_0 = arith.constant 0 : i32
    return %arg0, %c0_i32, %arg1 : i32, i32, i32
  }
  func.func @transform_1(%arg0: i32, %arg1: i32) -> (i32, i32, i32) {
    %c1_i32 = arith.constant 1 : i32
    %0 = arith.muli %arg1, %c1_i32 : i32
    %c1_i32_0 = arith.constant 1 : i32
    %1 = arith.subi %0, %c1_i32_0 : i32
    %c0_i32 = arith.constant 0 : i32
    %2 = arith.maxsi %1, %c0_i32 : i32
    %c0_i32_1 = arith.constant 0 : i32
    %c0_i32_2 = arith.constant 0 : i32
    return %arg0, %c0_i32_1, %2 : i32, i32, i32
  }
  func.func @transform_2(%arg0: i32, %arg1: i32) -> (i32, i32, i32) {
    %c1_i32 = arith.constant 1 : i32
    %0 = arith.addi %arg1, %c1_i32 : i32
    %c1_i32_0 = arith.constant 1 : i32
    %1 = arith.muli %0, %c1_i32_0 : i32
    %c1_i32_1 = arith.constant 1 : i32
    %2 = arith.minsi %1, %c1_i32_1 : i32
    %c0_i32 = arith.constant 0 : i32
    %c0_i32_2 = arith.constant 0 : i32
    return %arg0, %c0_i32, %2 : i32, i32, i32
  }
  func.func @transform_3(%arg0: i32, %arg1: i32) -> (i32, i32, i32) {
    %c0_i32 = arith.constant 0 : i32
    %c0_i32_0 = arith.constant 0 : i32
    %c0_i32_1 = arith.constant 0 : i32
    %c0_i32_2 = arith.constant 0 : i32
    return %c0_i32, %c0_i32_0, %c0_i32_1 : i32, i32, i32
  }
  func.func @transform_4(%arg0: i32, %arg1: i32) -> (i32, i32, i32) {
    %c0_i32 = arith.constant 0 : i32
    %c0_i32_0 = arith.constant 0 : i32
    return %arg0, %c0_i32, %arg1 : i32, i32, i32
  }
  func.func @transform_5(%arg0: i32, %arg1: i32) -> (i32, i32, i32, i32) {
    %c0_i32 = arith.constant 0 : i32
    %c0_i32_0 = arith.constant 0 : i32
    %c0_i32_1 = arith.constant 0 : i32
    return %arg0, %arg1, %c0_i32, %c0_i32_0 : i32, i32, i32, i32
  }
}

module attributes {stable_mosaic.version = 11 : i64} {
  func.func @_conv2_kernel(%arg0: i32, %arg1: i32, %arg2: memref<1x8x128xbf16, #tpu.memory_space<vmem>>, %arg3: memref<1x8x128xbf16, #tpu.memory_space<vmem>>, %arg4: memref<1x8x128xbf16, #tpu.memory_space<vmem>>, %arg5: memref<8x1xf32, #tpu.memory_space<vmem>>, %arg6: memref<8x1xf32, #tpu.memory_space<vmem>>, %arg7: memref<9x8x8xbf16, #tpu.memory_space<vmem>>, %arg8: memref<1x8x128xbf16, #tpu.memory_space<vmem>>, %arg9: memref<1x1x8x2xf32, #tpu.memory_space<vmem>>) attributes {dimension_semantics = [#tpu.dimension_semantics<parallel>, #tpu.dimension_semantics<parallel>], iteration_bounds = array<i64: 2, 2>, scalar_prefetch = 0 : i64, scratch_operands = 0 : i64, tpu.core_type = #tpu.core_type<tc>, window_params = [{transform_indices = @transform_0, window_bounds = array<i64: 1, 8, 128>}, {transform_indices = @transform_1, window_bounds = array<i64: 1, 8, 128>}, {transform_indices = @transform_2, window_bounds = array<i64: 1, 8, 128>}, {pipeline_mode = #tpu.pipeline_mode<synchronous>, transform_indices = @transform_3, window_bounds = array<i64: 8, 1>}, {pipeline_mode = #tpu.pipeline_mode<synchronous>, transform_indices = @transform_4, window_bounds = array<i64: 8, 1>}, {pipeline_mode = #tpu.pipeline_mode<synchronous>, transform_indices = @transform_5, window_bounds = array<i64: 9, 8, 8>}, {transform_indices = @transform_6, window_bounds = array<i64: 1, 8, 128>}, {transform_indices = @transform_7, window_bounds = array<i64: 1, 1, 8, 2>}]} {
    %c0 = arith.constant 0 : index
    %c0_0 = arith.constant 0 : index
    %0 = vector.load %arg5[%c0, %c0_0] : memref<8x1xf32, #tpu.memory_space<vmem>>, vector<8x1xf32>
    %c0_1 = arith.constant 0 : index
    %c0_2 = arith.constant 0 : index
    %1 = vector.load %arg6[%c0_1, %c0_2] : memref<8x1xf32, #tpu.memory_space<vmem>>, vector<8x1xf32>
    %c0_3 = arith.constant 0 : index
    %c0_4 = arith.constant 0 : index
    %c0_5 = arith.constant 0 : index
    %2 = vector.load %arg2[%c0_3, %c0_4, %c0_5] : memref<1x8x128xbf16, #tpu.memory_space<vmem>>, vector<1x8x128xbf16>
    %3 = vector.shape_cast %2 : vector<1x8x128xbf16> to vector<8x128xbf16>
    %4 = arith.extf %3 : vector<8x128xbf16> to vector<8x128xf32>
    %5 = vector.broadcast %0 : vector<8x1xf32> to vector<8x128xf32>
    %6 = arith.mulf %4, %5 : vector<8x128xf32>
    %7 = vector.broadcast %1 : vector<8x1xf32> to vector<8x128xf32>
    %8 = arith.addf %6, %7 : vector<8x128xf32>
    %cst = arith.constant 0.000000e+00 : f32
    %9 = vector.broadcast %cst : f32 to vector<8x128xf32>
    %10 = arith.maximumf %8, %9 : vector<8x128xf32>
    %c0_6 = arith.constant 0 : index
    %c0_7 = arith.constant 0 : index
    %c112 = arith.constant 112 : index
    %11 = vector.load %arg3[%c0_6, %c0_7, %c112] : memref<1x8x128xbf16, #tpu.memory_space<vmem>>, vector<1x8x16xbf16>
    %12 = vector.shape_cast %11 : vector<1x8x16xbf16> to vector<8x16xbf16>
    %13 = arith.extf %12 : vector<8x16xbf16> to vector<8x16xf32>
    %14 = vector.broadcast %0 : vector<8x1xf32> to vector<8x16xf32>
    %15 = arith.mulf %13, %14 : vector<8x16xf32>
    %16 = vector.broadcast %1 : vector<8x1xf32> to vector<8x16xf32>
    %17 = arith.addf %15, %16 : vector<8x16xf32>
    %cst_8 = arith.constant 0.000000e+00 : f32
    %18 = vector.broadcast %cst_8 : f32 to vector<8x16xf32>
    %19 = arith.maximumf %17, %18 : vector<8x16xf32>
    %c0_9 = arith.constant 0 : index
    %c0_10 = arith.constant 0 : index
    %c0_11 = arith.constant 0 : index
    %20 = vector.load %arg4[%c0_9, %c0_10, %c0_11] : memref<1x8x128xbf16, #tpu.memory_space<vmem>>, vector<1x8x16xbf16>
    %21 = vector.shape_cast %20 : vector<1x8x16xbf16> to vector<8x16xbf16>
    %22 = arith.extf %21 : vector<8x16xbf16> to vector<8x16xf32>
    %23 = vector.broadcast %0 : vector<8x1xf32> to vector<8x16xf32>
    %24 = arith.mulf %22, %23 : vector<8x16xf32>
    %25 = vector.broadcast %1 : vector<8x1xf32> to vector<8x16xf32>
    %26 = arith.addf %24, %25 : vector<8x16xf32>
    %cst_12 = arith.constant 0.000000e+00 : f32
    %27 = vector.broadcast %cst_12 : f32 to vector<8x16xf32>
    %28 = arith.maximumf %26, %27 : vector<8x16xf32>
    %c0_i32 = arith.constant 0 : i32
    %29 = arith.cmpi sgt, %arg1, %c0_i32 : i32
    %cst_13 = arith.constant 0.000000e+00 : f32
    %30 = vector.broadcast %cst_13 : f32 to vector<8x16xf32>
    %31 = arith.select %29, %19, %30 : vector<8x16xf32>
    %c1_i32 = arith.constant 1 : i32
    %32 = arith.cmpi slt, %arg1, %c1_i32 : i32
    %cst_14 = arith.constant 0.000000e+00 : f32
    %33 = vector.broadcast %cst_14 : f32 to vector<8x16xf32>
    %34 = arith.select %32, %28, %33 : vector<8x16xf32>
    %35 = tpu.iota {dimensions = array<i32: 1>} : vector<1x128xi32>
    %c16_i32 = arith.constant 16 : i32
    %c0_i32_15 = arith.constant 0 : i32
    %36 = arith.cmpi eq, %c16_i32, %c0_i32_15 : i32
    %c1_i32_16 = arith.constant 1 : i32
    %37 = arith.select %36, %c1_i32_16, %c16_i32 : i32
    %38 = vector.broadcast %37 : i32 to vector<1x128xi32>
    %39 = arith.remsi %35, %38 : vector<1x128xi32>
    %c0_i32_17 = arith.constant 0 : i32
    %40 = vector.broadcast %c0_i32_17 : i32 to vector<1x128xi32>
    %41 = arith.cmpi ne, %39, %40 : vector<1x128xi32>
    %c0_i32_18 = arith.constant 0 : i32
    %42 = vector.broadcast %c0_i32_18 : i32 to vector<1x128xi32>
    %43 = arith.cmpi slt, %39, %42 : vector<1x128xi32>
    %c0_i32_19 = arith.constant 0 : i32
    %44 = arith.cmpi slt, %37, %c0_i32_19 : i32
    %45 = vector.broadcast %44 : i1 to vector<1x128xi1>
    %46 = vector.broadcast %45 : vector<1x128xi1> to vector<1x128xi1>
    %47 = arith.xori %43, %46 : vector<1x128xi1>
    %48 = arith.andi %47, %41 : vector<1x128xi1>
    %49 = vector.broadcast %37 : i32 to vector<1x128xi32>
    %50 = arith.addi %39, %49 : vector<1x128xi32>
    %51 = arith.select %48, %50, %39 : vector<1x128xi1>, vector<1x128xi32>
    %52 = tpu.iota {dimensions = array<i32: 1>} : vector<1x16xi32>
    %c1_i32_20 = arith.constant 1 : i32
    %53 = vector.broadcast %c1_i32_20 : i32 to vector<1x128xi32>
    %54 = arith.cmpi sge, %51, %53 : vector<1x128xi32>
    %c14_i32 = arith.constant 14 : i32
    %55 = vector.broadcast %c14_i32 : i32 to vector<1x128xi32>
    %56 = arith.cmpi sle, %51, %55 : vector<1x128xi32>
    %c1_i32_21 = arith.constant 1 : i32
    %57 = vector.broadcast %c1_i32_21 : i32 to vector<1x16xi32>
    %58 = arith.cmpi sge, %52, %57 : vector<1x16xi32>
    %c14_i32_22 = arith.constant 14 : i32
    %59 = vector.broadcast %c14_i32_22 : i32 to vector<1x16xi32>
    %60 = arith.cmpi sle, %52, %59 : vector<1x16xi32>
    %c1_i32_23 = arith.constant 1 : i32
    %61 = tpu.dynamic_rotate %10 by %c1_i32_23 dim 1 : vector<8x128xf32>, i32 -> vector<8x128xf32>
    %cst_24 = arith.constant 0.000000e+00 : f32
    %62 = vector.shape_cast %54 : vector<1x128xi1> to vector<1x128xi1>
    %63 = vector.broadcast %62 : vector<1x128xi1> to vector<8x128xi1>
    %64 = vector.broadcast %cst_24 : f32 to vector<8x128xf32>
    %65 = arith.select %63, %61, %64 : vector<8x128xi1>, vector<8x128xf32>
    %c127_i32 = arith.constant 127 : i32
    %66 = tpu.dynamic_rotate %10 by %c127_i32 dim 1 : vector<8x128xf32>, i32 -> vector<8x128xf32>
    %cst_25 = arith.constant 0.000000e+00 : f32
    %67 = vector.shape_cast %56 : vector<1x128xi1> to vector<1x128xi1>
    %68 = vector.broadcast %67 : vector<1x128xi1> to vector<8x128xi1>
    %69 = vector.broadcast %cst_25 : f32 to vector<8x128xf32>
    %70 = arith.select %68, %66, %69 : vector<8x128xi1>, vector<8x128xf32>
    %71 = vector.extract_strided_slice %31 {offsets = [0, 15], sizes = [8, 1], strides = [1, 1]} : vector<8x16xf32> to vector<8x1xf32>
    %72 = vector.extract_strided_slice %31 {offsets = [0, 0], sizes = [8, 15], strides = [1, 1]} : vector<8x16xf32> to vector<8x15xf32>
    %73 = tpu.concatenate %71, %72 in 1 : vector<8x1xf32>, vector<8x15xf32> -> vector<8x16xf32>
    %cst_26 = arith.constant 0.000000e+00 : f32
    %74 = vector.shape_cast %58 : vector<1x16xi1> to vector<1x16xi1>
    %75 = vector.broadcast %74 : vector<1x16xi1> to vector<8x16xi1>
    %76 = vector.broadcast %cst_26 : f32 to vector<8x16xf32>
    %77 = arith.select %75, %73, %76 : vector<8x16xi1>, vector<8x16xf32>
    %78 = vector.extract_strided_slice %31 {offsets = [0, 1], sizes = [8, 15], strides = [1, 1]} : vector<8x16xf32> to vector<8x15xf32>
    %79 = vector.extract_strided_slice %31 {offsets = [0, 0], sizes = [8, 1], strides = [1, 1]} : vector<8x16xf32> to vector<8x1xf32>
    %80 = tpu.concatenate %78, %79 in 1 : vector<8x15xf32>, vector<8x1xf32> -> vector<8x16xf32>
    %cst_27 = arith.constant 0.000000e+00 : f32
    %81 = vector.shape_cast %60 : vector<1x16xi1> to vector<1x16xi1>
    %82 = vector.broadcast %81 : vector<1x16xi1> to vector<8x16xi1>
    %83 = vector.broadcast %cst_27 : f32 to vector<8x16xf32>
    %84 = arith.select %82, %80, %83 : vector<8x16xi1>, vector<8x16xf32>
    %85 = vector.extract_strided_slice %34 {offsets = [0, 15], sizes = [8, 1], strides = [1, 1]} : vector<8x16xf32> to vector<8x1xf32>
    %86 = vector.extract_strided_slice %34 {offsets = [0, 0], sizes = [8, 15], strides = [1, 1]} : vector<8x16xf32> to vector<8x15xf32>
    %87 = tpu.concatenate %85, %86 in 1 : vector<8x1xf32>, vector<8x15xf32> -> vector<8x16xf32>
    %cst_28 = arith.constant 0.000000e+00 : f32
    %88 = vector.shape_cast %58 : vector<1x16xi1> to vector<1x16xi1>
    %89 = vector.broadcast %88 : vector<1x16xi1> to vector<8x16xi1>
    %90 = vector.broadcast %cst_28 : f32 to vector<8x16xf32>
    %91 = arith.select %89, %87, %90 : vector<8x16xi1>, vector<8x16xf32>
    %92 = vector.extract_strided_slice %34 {offsets = [0, 1], sizes = [8, 15], strides = [1, 1]} : vector<8x16xf32> to vector<8x15xf32>
    %93 = vector.extract_strided_slice %34 {offsets = [0, 0], sizes = [8, 1], strides = [1, 1]} : vector<8x16xf32> to vector<8x1xf32>
    %94 = tpu.concatenate %92, %93 in 1 : vector<8x15xf32>, vector<8x1xf32> -> vector<8x16xf32>
    %cst_29 = arith.constant 0.000000e+00 : f32
    %95 = vector.shape_cast %60 : vector<1x16xi1> to vector<1x16xi1>
    %96 = vector.broadcast %95 : vector<1x16xi1> to vector<8x16xi1>
    %97 = vector.broadcast %cst_29 : f32 to vector<8x16xf32>
    %98 = arith.select %96, %94, %97 : vector<8x16xi1>, vector<8x16xf32>
    %cst_30 = arith.constant 0.000000e+00 : f32
    %99 = vector.broadcast %cst_30 : f32 to vector<8x128xf32>
    %c3 = arith.constant 3 : index
    %c0_31 = arith.constant 0 : index
    %c0_32 = arith.constant 0 : index
    %100 = vector.load %arg7[%c3, %c0_31, %c0_32] : memref<9x8x8xbf16, #tpu.memory_space<vmem>>, vector<1x8x8xbf16>
    %101 = vector.shape_cast %100 : vector<1x8x8xbf16> to vector<8x8xbf16>
    %102 = arith.truncf %65 : vector<8x128xf32> to vector<8x128xbf16>
    %cst_33 = arith.constant dense<0.000000e+00> : vector<8x128xf32>
    %103 = tpu.matmul %101, %102, %cst_33 {dimension_numbers = #tpu.dot_dimension_numbers<[1], [0], [0], [1], [0, 0, 1, 1], [], []>} : vector<8x8xbf16>, vector<8x128xbf16>, vector<8x128xf32> -> vector<8x128xf32>
    %104 = arith.addf %99, %103 : vector<8x128xf32>
    %c4 = arith.constant 4 : index
    %c0_34 = arith.constant 0 : index
    %c0_35 = arith.constant 0 : index
    %105 = vector.load %arg7[%c4, %c0_34, %c0_35] : memref<9x8x8xbf16, #tpu.memory_space<vmem>>, vector<1x8x8xbf16>
    %106 = vector.shape_cast %105 : vector<1x8x8xbf16> to vector<8x8xbf16>
    %107 = arith.truncf %10 : vector<8x128xf32> to vector<8x128xbf16>
    %cst_36 = arith.constant dense<0.000000e+00> : vector<8x128xf32>
    %108 = tpu.matmul %106, %107, %cst_36 {dimension_numbers = #tpu.dot_dimension_numbers<[1], [0], [0], [1], [0, 0, 1, 1], [], []>} : vector<8x8xbf16>, vector<8x128xbf16>, vector<8x128xf32> -> vector<8x128xf32>
    %109 = arith.addf %104, %108 : vector<8x128xf32>
    %c5 = arith.constant 5 : index
    %c0_37 = arith.constant 0 : index
    %c0_38 = arith.constant 0 : index
    %110 = vector.load %arg7[%c5, %c0_37, %c0_38] : memref<9x8x8xbf16, #tpu.memory_space<vmem>>, vector<1x8x8xbf16>
    %111 = vector.shape_cast %110 : vector<1x8x8xbf16> to vector<8x8xbf16>
    %112 = arith.truncf %70 : vector<8x128xf32> to vector<8x128xbf16>
    %cst_39 = arith.constant dense<0.000000e+00> : vector<8x128xf32>
    %113 = tpu.matmul %111, %112, %cst_39 {dimension_numbers = #tpu.dot_dimension_numbers<[1], [0], [0], [1], [0, 0, 1, 1], [], []>} : vector<8x8xbf16>, vector<8x128xbf16>, vector<8x128xf32> -> vector<8x128xf32>
    %114 = arith.addf %109, %113 : vector<8x128xf32>
    %115 = vector.extract_strided_slice %65 {offsets = [0, 0], sizes = [8, 112], strides = [1, 1]} : vector<8x128xf32> to vector<8x112xf32>
    %116 = tpu.concatenate %77, %115 in 1 : vector<8x16xf32>, vector<8x112xf32> -> vector<8x128xf32>
    %c0_40 = arith.constant 0 : index
    %c0_41 = arith.constant 0 : index
    %c0_42 = arith.constant 0 : index
    %117 = vector.load %arg7[%c0_40, %c0_41, %c0_42] : memref<9x8x8xbf16, #tpu.memory_space<vmem>>, vector<1x8x8xbf16>
    %118 = vector.shape_cast %117 : vector<1x8x8xbf16> to vector<8x8xbf16>
    %119 = arith.truncf %116 : vector<8x128xf32> to vector<8x128xbf16>
    %cst_43 = arith.constant dense<0.000000e+00> : vector<8x128xf32>
    %120 = tpu.matmul %118, %119, %cst_43 {dimension_numbers = #tpu.dot_dimension_numbers<[1], [0], [0], [1], [0, 0, 1, 1], [], []>} : vector<8x8xbf16>, vector<8x128xbf16>, vector<8x128xf32> -> vector<8x128xf32>
    %121 = arith.addf %114, %120 : vector<8x128xf32>
    %122 = vector.extract_strided_slice %10 {offsets = [0, 0], sizes = [8, 112], strides = [1, 1]} : vector<8x128xf32> to vector<8x112xf32>
    %123 = tpu.concatenate %31, %122 in 1 : vector<8x16xf32>, vector<8x112xf32> -> vector<8x128xf32>
    %c1 = arith.constant 1 : index
    %c0_44 = arith.constant 0 : index
    %c0_45 = arith.constant 0 : index
    %124 = vector.load %arg7[%c1, %c0_44, %c0_45] : memref<9x8x8xbf16, #tpu.memory_space<vmem>>, vector<1x8x8xbf16>
    %125 = vector.shape_cast %124 : vector<1x8x8xbf16> to vector<8x8xbf16>
    %126 = arith.truncf %123 : vector<8x128xf32> to vector<8x128xbf16>
    %cst_46 = arith.constant dense<0.000000e+00> : vector<8x128xf32>
    %127 = tpu.matmul %125, %126, %cst_46 {dimension_numbers = #tpu.dot_dimension_numbers<[1], [0], [0], [1], [0, 0, 1, 1], [], []>} : vector<8x8xbf16>, vector<8x128xbf16>, vector<8x128xf32> -> vector<8x128xf32>
    %128 = arith.addf %121, %127 : vector<8x128xf32>
    %129 = vector.extract_strided_slice %70 {offsets = [0, 0], sizes = [8, 112], strides = [1, 1]} : vector<8x128xf32> to vector<8x112xf32>
    %130 = tpu.concatenate %84, %129 in 1 : vector<8x16xf32>, vector<8x112xf32> -> vector<8x128xf32>
    %c2 = arith.constant 2 : index
    %c0_47 = arith.constant 0 : index
    %c0_48 = arith.constant 0 : index
    %131 = vector.load %arg7[%c2, %c0_47, %c0_48] : memref<9x8x8xbf16, #tpu.memory_space<vmem>>, vector<1x8x8xbf16>
    %132 = vector.shape_cast %131 : vector<1x8x8xbf16> to vector<8x8xbf16>
    %133 = arith.truncf %130 : vector<8x128xf32> to vector<8x128xbf16>
    %cst_49 = arith.constant dense<0.000000e+00> : vector<8x128xf32>
    %134 = tpu.matmul %132, %133, %cst_49 {dimension_numbers = #tpu.dot_dimension_numbers<[1], [0], [0], [1], [0, 0, 1, 1], [], []>} : vector<8x8xbf16>, vector<8x128xbf16>, vector<8x128xf32> -> vector<8x128xf32>
    %135 = arith.addf %128, %134 : vector<8x128xf32>
    %136 = vector.extract_strided_slice %65 {offsets = [0, 16], sizes = [8, 112], strides = [1, 1]} : vector<8x128xf32> to vector<8x112xf32>
    %137 = tpu.concatenate %136, %91 in 1 : vector<8x112xf32>, vector<8x16xf32> -> vector<8x128xf32>
    %c6 = arith.constant 6 : index
    %c0_50 = arith.constant 0 : index
    %c0_51 = arith.constant 0 : index
    %138 = vector.load %arg7[%c6, %c0_50, %c0_51] : memref<9x8x8xbf16, #tpu.memory_space<vmem>>, vector<1x8x8xbf16>
    %139 = vector.shape_cast %138 : vector<1x8x8xbf16> to vector<8x8xbf16>
    %140 = arith.truncf %137 : vector<8x128xf32> to vector<8x128xbf16>
    %cst_52 = arith.constant dense<0.000000e+00> : vector<8x128xf32>
    %141 = tpu.matmul %139, %140, %cst_52 {dimension_numbers = #tpu.dot_dimension_numbers<[1], [0], [0], [1], [0, 0, 1, 1], [], []>} : vector<8x8xbf16>, vector<8x128xbf16>, vector<8x128xf32> -> vector<8x128xf32>
    %142 = arith.addf %135, %141 : vector<8x128xf32>
    %143 = vector.extract_strided_slice %10 {offsets = [0, 16], sizes = [8, 112], strides = [1, 1]} : vector<8x128xf32> to vector<8x112xf32>
    %144 = tpu.concatenate %143, %34 in 1 : vector<8x112xf32>, vector<8x16xf32> -> vector<8x128xf32>
    %c7 = arith.constant 7 : index
    %c0_53 = arith.constant 0 : index
    %c0_54 = arith.constant 0 : index
    %145 = vector.load %arg7[%c7, %c0_53, %c0_54] : memref<9x8x8xbf16, #tpu.memory_space<vmem>>, vector<1x8x8xbf16>
    %146 = vector.shape_cast %145 : vector<1x8x8xbf16> to vector<8x8xbf16>
    %147 = arith.truncf %144 : vector<8x128xf32> to vector<8x128xbf16>
    %cst_55 = arith.constant dense<0.000000e+00> : vector<8x128xf32>
    %148 = tpu.matmul %146, %147, %cst_55 {dimension_numbers = #tpu.dot_dimension_numbers<[1], [0], [0], [1], [0, 0, 1, 1], [], []>} : vector<8x8xbf16>, vector<8x128xbf16>, vector<8x128xf32> -> vector<8x128xf32>
    %149 = arith.addf %142, %148 : vector<8x128xf32>
    %150 = vector.extract_strided_slice %70 {offsets = [0, 16], sizes = [8, 112], strides = [1, 1]} : vector<8x128xf32> to vector<8x112xf32>
    %151 = tpu.concatenate %150, %98 in 1 : vector<8x112xf32>, vector<8x16xf32> -> vector<8x128xf32>
    %c8 = arith.constant 8 : index
    %c0_56 = arith.constant 0 : index
    %c0_57 = arith.constant 0 : index
    %152 = vector.load %arg7[%c8, %c0_56, %c0_57] : memref<9x8x8xbf16, #tpu.memory_space<vmem>>, vector<1x8x8xbf16>
    %153 = vector.shape_cast %152 : vector<1x8x8xbf16> to vector<8x8xbf16>
    %154 = arith.truncf %151 : vector<8x128xf32> to vector<8x128xbf16>
    %cst_58 = arith.constant dense<0.000000e+00> : vector<8x128xf32>
    %155 = tpu.matmul %153, %154, %cst_58 {dimension_numbers = #tpu.dot_dimension_numbers<[1], [0], [0], [1], [0, 0, 1, 1], [], []>} : vector<8x8xbf16>, vector<8x128xbf16>, vector<8x128xf32> -> vector<8x128xf32>
    %156 = arith.addf %149, %155 : vector<8x128xf32>
    %157 = arith.truncf %156 : vector<8x128xf32> to vector<8x128xbf16>
    %c0_59 = arith.constant 0 : index
    %c0_60 = arith.constant 0 : index
    %c0_61 = arith.constant 0 : index
    %158 = vector.load %arg8[%c0_59, %c0_60, %c0_61] : memref<1x8x128xbf16, #tpu.memory_space<vmem>>, vector<1x8x128xbf16>
    %159 = vector.shape_cast %158 : vector<1x8x128xbf16> to vector<8x128xbf16>
    %160 = vector.shape_cast %157 : vector<8x128xbf16> to vector<1x8x128xbf16>
    tpu.vector_store %arg8[%c0_59, %c0_60, %c0_61], %160 {strides = array<i32>} : memref<1x8x128xbf16, #tpu.memory_space<vmem>>, vector<1x8x128xbf16>,
    %cst_62 = arith.constant dense<0.000000e+00> : vector<8xf32>
    %161 = vector.multi_reduction <add>, %156, %cst_62 [1] : vector<8x128xf32> to vector<8xf32>
    %162 = vector.shape_cast %161 : vector<8xf32> to vector<8x1xf32>
    %163 = arith.mulf %156, %156 : vector<8x128xf32>
    %cst_63 = arith.constant dense<0.000000e+00> : vector<8xf32>
    %164 = vector.multi_reduction <add>, %163, %cst_63 [1] : vector<8x128xf32> to vector<8xf32>
    %165 = vector.shape_cast %164 : vector<8xf32> to vector<8x1xf32>
    %166 = tpu.concatenate %162, %165 in 1 : vector<8x1xf32>, vector<8x1xf32> -> vector<8x2xf32>
    %c0_64 = arith.constant 0 : index
    %c0_65 = arith.constant 0 : index
    %c0_66 = arith.constant 0 : index
    %c0_67 = arith.constant 0 : index
    %167 = vector.load %arg9[%c0_64, %c0_65, %c0_66, %c0_67] : memref<1x1x8x2xf32, #tpu.memory_space<vmem>>, vector<1x1x8x2xf32>
    %168 = vector.shape_cast %167 : vector<1x1x8x2xf32> to vector<8x2xf32>
    %169 = vector.shape_cast %166 : vector<8x2xf32> to vector<1x1x8x2xf32>
    tpu.vector_store %arg9[%c0_64, %c0_65, %c0_66, %c0_67], %169 {strides = array<i32>} : memref<1x1x8x2xf32, #tpu.memory_space<vmem>>, vector<1x1x8x2xf32>,
    return
  }
  func.func @transform_0(%arg0: i32, %arg1: i32) -> (i32, i32, i32) {
    %c0_i32 = arith.constant 0 : i32
    %c0_i32_0 = arith.constant 0 : i32
    return %arg0, %c0_i32, %arg1 : i32, i32, i32
  }
  func.func @transform_1(%arg0: i32, %arg1: i32) -> (i32, i32, i32) {
    %c1_i32 = arith.constant 1 : i32
    %0 = arith.muli %arg1, %c1_i32 : i32
    %c1_i32_0 = arith.constant 1 : i32
    %1 = arith.subi %0, %c1_i32_0 : i32
    %c0_i32 = arith.constant 0 : i32
    %2 = arith.maxsi %1, %c0_i32 : i32
    %c0_i32_1 = arith.constant 0 : i32
    %c0_i32_2 = arith.constant 0 : i32
    return %arg0, %c0_i32_1, %2 : i32, i32, i32
  }
  func.func @transform_2(%arg0: i32, %arg1: i32) -> (i32, i32, i32) {
    %c1_i32 = arith.constant 1 : i32
    %0 = arith.addi %arg1, %c1_i32 : i32
    %c1_i32_0 = arith.constant 1 : i32
    %1 = arith.muli %0, %c1_i32_0 : i32
    %c1_i32_1 = arith.constant 1 : i32
    %2 = arith.minsi %1, %c1_i32_1 : i32
    %c0_i32 = arith.constant 0 : i32
    %c0_i32_2 = arith.constant 0 : i32
    return %arg0, %c0_i32, %2 : i32, i32, i32
  }
  func.func @transform_3(%arg0: i32, %arg1: i32) -> (i32, i32) {
    %c0_i32 = arith.constant 0 : i32
    %c0_i32_0 = arith.constant 0 : i32
    %c0_i32_1 = arith.constant 0 : i32
    return %c0_i32, %c0_i32_0 : i32, i32
  }
  func.func @transform_4(%arg0: i32, %arg1: i32) -> (i32, i32) {
    %c0_i32 = arith.constant 0 : i32
    %c0_i32_0 = arith.constant 0 : i32
    %c0_i32_1 = arith.constant 0 : i32
    return %c0_i32, %c0_i32_0 : i32, i32
  }
  func.func @transform_5(%arg0: i32, %arg1: i32) -> (i32, i32, i32) {
    %c0_i32 = arith.constant 0 : i32
    %c0_i32_0 = arith.constant 0 : i32
    %c0_i32_1 = arith.constant 0 : i32
    %c0_i32_2 = arith.constant 0 : i32
    return %c0_i32, %c0_i32_0, %c0_i32_1 : i32, i32, i32
  }
  func.func @transform_6(%arg0: i32, %arg1: i32) -> (i32, i32, i32) {
    %c0_i32 = arith.constant 0 : i32
    %c0_i32_0 = arith.constant 0 : i32
    return %arg0, %c0_i32, %arg1 : i32, i32, i32
  }
  func.func @transform_7(%arg0: i32, %arg1: i32) -> (i32, i32, i32, i32) {
    %c0_i32 = arith.constant 0 : i32
    %c0_i32_0 = arith.constant 0 : i32
    %c0_i32_1 = arith.constant 0 : i32
    return %arg0, %arg1, %c0_i32, %c0_i32_0 : i32, i32, i32, i32
  }
}

</mosaic_0001>

<bundles_post_ra>
// kernel: double_conv.2
= control target key start
LH: loop header
LB: loop body
LE: loop exit
PB: predicated region body
PF: predicated region fallthrough
CT: control target
= control target key end

     0   :  { %s1409_s18 = smov 0   ;;  %s1411_s19 = smov 0   ;;  %s1616_s0 = inlined_call_operand.vmem [shape: f32[2,8,256], index: 0, kind: input, shape index: {}, may-alias: {0,1,2}]   ;;  %s1617_s1 = inlined_call_operand.vmem [shape: f32[2,8,256], index: 1, kind: input, shape index: {}, may-alias: {0,1,2}]   ;;  %s1618_s2 = inlined_call_operand.vmem [shape: f32[2,8,256], index: 2, kind: input, shape index: {}, may-alias: {0,1,2}]   ;;  %s1619_s3 = inlined_call_operand.vmem [shape: bf16[9,8,8], index: 3, kind: input, shape index: {}]   ;;  %s1620_s4 = inlined_call_operand.vmem [shape: bf16[2,8,256], index: 4, kind: output, shape index: {0}]   ;;  %s1621_s5 = inlined_call_operand.vmem [shape: f32[2,2,8,2], index: 5, kind: output, shape index: {1}]  }
   0x1   :  { %s1413_s20 = smov 0   ;;  %s1415_s21 = smov 0  }
   0x2   :  { %s1417_s22 = smov 0  }
   0x3 LB: > { %s25_s23 = sadd.s32 1, %s1359_s20  ;;  %s28_s24 = sadd.s32 1, %s1363_s21  ;;  %s1367_s22 = sphi %s1417_s22, %s16_s22   ;;  %s1363_s21 = sphi %s1415_s21, %s1625_s21   ;;  %s1359_s20 = sphi %s1413_s20, %s1624_s20   ;;  %s1355_s19 = sphi %s1411_s19, %s1623_s19   ;;  %s1351_s18 = sphi %s1409_s18, %s1622_s18  }
   0x4   : > { %p26_p0 = scmp.ge.s32.totalorder %s25_s23, 2  ;;  %p1140_p1 = scmp.ge.s32.totalorder %s1367_s22, 1 }
   0x5   : > { %p265_p2 = scmp.lt.s32.totalorder %s1367_s22, 5 }
   0x6   : > { %s1627_s23 = smov (%p26_p0, %s25_s23), 0  ;;  %s1629_s24 = smov (!%p26_p0, %s28_s24), %s1363_s21 }
   0x7   : > { %p266_p3 = pnand %p1140_p1, %p265_p2  ;;  %p30_p4 = scmp.ge.s32.totalorder %s1629_s24, 2 }
   0x8   : > { %p329_p5 = scmp.lt.s32.totalorder (!%p266_p3), %s1355_s19, 1  ;;  %p331_p6 = scmp.lt.s32.totalorder (!%p266_p3), %s1351_s18, 1 }
   0x9   : > { %s1631_s24 = smov (%p30_p4, %s1629_s24), 0  ;;  %269 = sbr.rel (%p266_p3) target bundleno = 618 (0x26a), region = 36 }
   0xa   : > { %s351_s25 = sadd.s32 (!%p266_p3), 1, %s1351_s18  ;;  %s1370_s8 = smov (!%p266_p3), 1  }
   0xb   : > { %p352_p7 = scmp.lt.s32.totalorder (!%p266_p3), %s351_s25, 1  ;;  %s1143_s9 = sadd.s32 (!%p266_p3), 4294967295, %s1351_s18 }
   0xc   : > { %p338_p8 = scmp.gt.s32.totalorder (!%p266_p3), %s1143_s9, 0  ;;  %s1371_s12 = smov (!%p266_p3), 127  }
   0xd   : > { %p1144_p9 = scmp.lt.s32.totalorder (!%p266_p3), %s1143_s9, 1  ;;  %p383_p10 = scmp.gt.s32.totalorder (!%p266_p3), %s1351_s18, 0 }
   0xe   : > { %s1633_s19 = smov (!%p329_p5, %s1355_s19), 1  ;;  %v1369_v0 = vmov 0.0   ;;  %s1635_s25 = smov (!%p352_p7, %s351_s25), 1  ;;  %vm473_vm0 = vcmask 1043456   ;;  %vm1372_vm1 = vmmov 0   ;;  %vm469_vm2 = vcmask 64512  }
   0xf   : > { %s332_s26 = scalar_select %p331_p6, %s1351_s18, 1  ;;  %1205 = vmatprep.subr.bf16.mxu1 %v1369_v0  ;;  %1199 = vmatprep.subr.bf16.mxu0 %v1369_v0  ;;  %v1161_v5 = vld [vmem:[%s1619_s3 + $0x10] sm:$0xf]  ;;  %v395_v8 = vlaneseq  ;;  %v1160_v18 = vld [vmem:[%s1619_s3 + $0xc] sm:$0xf]  ;;  %vm430_vm5 = vcmask 7168  }
  0x10   : > { %s1446_s27 = sshll.u32 %s1633_s19, 1  ;;  %s1637_s25 = smov (!%p352_p7, %s1635_s25), 1  ;;  %1201 = vmatprep.mubr.msk.bf16.mxu0 %vm1372_vm1, %v1369_v0  ;;  %1207 = vmatprep.mubr.msk.bf16.mxu1 %vm1372_vm1, %v1369_v0  ;;  %v1164_v22 = vld [vmem:[%s1619_s3 + $0x14] sm:$0xf]  ;;  %vm441_vm7 = vcmask 121856   ;;  %vm617_vm9 = vcmask 130048  }
  0x11   : > { %s1449_s28 = sadd.s32 %s1446_s27, %s332_s26  ;;  %s359_s10 = sadd.s32 %s1446_s27, %s1637_s25  ;;  %v1505_v9 = vand.u32 127, %v395_v8  ;;  %v619_v54 = vld [vmem:[%s1619_s3] sm:$0xf]  ;;  %v1167_v55 = vld [vmem:[%s1619_s3 + $0x4] sm:$0xf]  ;;  %vm788_vm10 = vcmask 916480  }
  0x12   : > { %s1142_s29 = sshll.u32 %s1449_s28, 3  ;;  %s1155_s11 = sshll.u32 %s359_s10, 3  ;;  %vm963_vm11 = vcmask 15360  }
  0x13   : > { %s336_s7 = scalar_lea.vmem %s1616_s0, %s1142_s29  ;;  %s361_s15 = scalar_lea.vmem %s1618_s2, %s1155_s11  ;;  %v401_v10 = vand.u32 15, %v1505_v9  ;;  %vm411_vm6 = vcmp.ge.s32.totalorder %v1505_v9, 1  ;;  %vm412_vm8 = vcmp.le.s32.totalorder %v1505_v9, 14 }
  0x14   : > { %v1459_v1 = vld [vmem:[%s336_s7] sm:$0xff]  ;;  %s1324_s16 = scalar_select %p331_p6, 255, 0 }
  0x15   : > { %413 = vrot.lane.b32.xlu0 %v1459_v1, %s1370_s8  ;;  %v468_v2 = vpack.c.bf16 %v1459_v1, %v1459_v1  ;;  %s339_s17 = scalar_select %p338_p8, %s1143_s9, 0  ;;  %vm409_vm3 = vcmp.ge.s32.totalorder %v401_v10, 1  ;;  %vm410_vm4 = vcmp.le.s32.totalorder %v401_v10, 14 }
  0x16   : > { %v1478_v4 = vld [vmem:[%s361_s15] sm:%s1324_s16]  ;;  %s1373_s26 = smov 113   ;;  %s1376_s13 = smov 16  }
  0x17   : > { %v475_v3 = vsel %vm473_vm0, %v468_v2, 0  ;;  %447 = vrot.lane.b32.xlu1 %v1478_v4, %s1373_s26  ;;  %s1639_s17 = smov (!%p1144_p9, %s339_s17), 1  ;;  %v1313_v6 = vpack.i.bf16 %v1478_v4, %v1459_v1  ;;  %s1377_s14 = smov 31  }
  0x18   : > { %1200 = vmatpush3.bf16.msra.mxu0 %v475_v3  ;;  %s345_s30 = sadd.s32 %s1639_s17, %s1446_s27  ;;  %s1375_s27 = smov 17   ;;  %v1169_v3 = vld [vmem:[%s1619_s3 + $0x8] sm:$0xf] }
  0x19   : > { %418 = vrot.lane.b32.xlu0 %v1459_v1, %s1371_s12  ;;  %1211 = vmatprep.subr.bf16.mxu0 %v1369_v0  ;;  %s1150_s6 = sshll.u32 %s345_s30, 3  ;;  %s1378_s17 = smov 112  }
  0x1a   : > { %s347_s11 = scalar_lea.vmem %s1617_s1, %s1150_s6  ;;  %s380_s19 = scalar_lea.vmem %s1621_s5, %s1142_s29 }
  0x1b   : > { %1202 = vmatmul.mubr.msk.bf16.vlgmr.msra.gmra.mxu0 %vm469_vm2, %v1161_v5  ;;  %450 = vrot.lane.b32.xlu1 %v1478_v4, %s1370_s8  ;;  %s1327_s9 = scalar_select %p383_p10, 255, 0 }
  0x1c   : > { %1213 = vmatprep.mubr.msk.bf16.mxu0 %vm1372_vm1, %v1369_v0 }
  0x1d   : > { %455 = vrot.lane.b32.xlu0 %v1478_v4, %s1371_s12  ;;  %v1328_v7 = vld [vmem:[%s347_s11] sm:%s1327_s9]  ;;  %s1374_s12 = smov 15  }
  0x1f   : > { %458 = vrot.lane.b32.xlu1 %v1478_v4, %s1374_s12 }
  0x21   : > { %424 = vrot.lane.b32.xlu0 %v1328_v7, %s1370_s8 }
  0x23   : > { %427 = vrot.lane.b32.xlu1 %v1328_v7, %s1375_s27 }
  0x27   : > { %672 = vrot.lane.b32.xlu1 %v1459_v1, %s1376_s13 }
  0x2b   : > { %438 = vrot.lane.b32.xlu1 %v1328_v7, %s1377_s14  ;;  %s1157_s14 = sshll.u32 %s1449_s28, 2 }
  0x2c   : > { %s372_s15 = scalar_lea.vmem %s1620_s4, %s1157_s14 }
  0x87   : > { %v414_v11 = vpop.permute.xlu0 %413 }
  0x88   : > { %v417_v12 = vsel %vm409_vm3, %v414_v11, 0.0 }
  0x89   : > { %v1303_v13 = vpack.i.bf16 %v1328_v7, %v417_v12  ;;  %v465_v14 = vpack.c.bf16 %v417_v12, %v417_v12  ;;  %v448_v21 = vpop.permute.xlu1 %447 }
  0x8b   : > { %1304 = vrot.lane.b32.xlu0 %v1303_v13, %s1376_s13  ;;  %v521_v15 = vsel %vm473_vm0, %v465_v14, 0  ;;  %v419_v16 = vpop.permute.xlu0 %418  ;;  %v1171_v13 = vld [vmem:[%s1619_s3 + $0x18] sm:$0xf] }
  0x8c   : > { %1206 = vmatpush3.bf16.msra.mxu1 %v521_v15  ;;  %v422_v17 = vsel %vm410_vm4, %v419_v16, 0.0  ;;  %v1173_v16 = vld [vmem:[%s1619_s3 + $0x1c] sm:$0xf] }
  0x8d   : > { %v565_v19 = vpack.c.bf16 %v422_v17, %v422_v17  ;;  %1217 = vmatprep.subr.bf16.mxu1 %v1369_v0  ;;  %v451_v23 = vpop.permute.xlu1 %450 }
  0x8e   : > { %v453_v24 = vsel %vm430_vm5, %v448_v21, %v451_v23 }
  0x8f   : > { %435 = vrot.lane.b32.xlu0 %v1328_v7, %s1374_s12  ;;  %v570_v20 = vsel %vm473_vm0, %v565_v19, 0  ;;  %1208 = vmatmul.mubr.msk.bf16.vlgmr.msra.gmra.mxu1 %vm469_vm2, %v1160_v18  ;;  %v454_v25 = vsel %vm411_vm6, %v453_v24, 0.0  ;;  %v456_v26 = vpop.permute.xlu0 %455  ;;  %v1175_v18 = vld [vmem:[%s1619_s3 + $0x20] sm:$0xf] }
  0x90   : > { %1212 = vmatpush3.bf16.msra.mxu0 %v570_v20  ;;  %1219 = vmatprep.mubr.msk.bf16.mxu1 %vm1372_vm1, %v1369_v0  ;;  %v1308_v27 = vpack.i.bf16 %v454_v25, %v417_v12 }
  0x91   : > { %1223 = vmatprep.subr.bf16.mxu0 %v1369_v0  ;;  %v459_v28 = vpop.permute.xlu1 %458 }
  0x92   : > { %v461_v29 = vsel %vm441_vm7, %v456_v26, %v459_v28  ;;  %1309 = vrot.lane.b32.xlu1 %v1308_v27, %s1378_s17 }
  0x93   : > { %727 = vrot.lane.b32.xlu0 %v422_v17, %s1376_s13  ;;  %1214 = vmatmul.mubr.msk.bf16.vlgmr.msra.gmra.mxu0 %vm469_vm2, %v1164_v22  ;;  %v462_v30 = vsel %vm412_vm8, %v461_v29, 0.0  ;;  %v425_v37 = vpop.permute.xlu0 %424 }
  0x94   : > { %1225 = vmatprep.mubr.msk.bf16.mxu0 %vm1372_vm1, %v1369_v0  ;;  %v1318_v31 = vpack.i.bf16 %v462_v30, %v422_v17 }
  0x95   : > { %v428_v36 = vpop.permute.xlu1 %427 }
  0x96   : > { %1319 = vrot.lane.b32.xlu1 %v1318_v31, %s1378_s17  ;;  %v431_v39 = vsel %vm430_vm5, %v425_v37, %v428_v36 }
  0x97   : > { %1314 = vrot.lane.b32.xlu0 %v1313_v6, %s1378_s17  ;;  %v434_v43 = vsel %vm411_vm6, %v431_v39, 0.0 }
  0x99   : > { %v673_v38 = vpop.permute.xlu1 %672 }
  0x9d   : > { %v439_v46 = vpop.permute.xlu1 %438 }
  0xdb   : > { %v1534_v32 = vpop.f32.mrf.mxu0 }
  0xdd   : > { %v1203_v33 = vpop.f32.mrf.mxu0 }
  0xdf   : > { %v514_v34 = vpop.f32.mrf.mxu0 }
  0xe1   : > { %v1204_v35 = vpop.f32.mrf.mxu0 }
  0xfd   : > { %v1305_v40 = vpop.permute.xlu0 %1304 }
  0xfe   : > { %v1307_v41 = vunpack.i.h.bf16 %v1305_v40  ;;  %v1306_v42 = vunpack.i.l.bf16 %v1305_v40 }
 0x100   : > { %v618_v44 = vsel %vm617_vm9, %v434_v43, %v1306_v42  ;;  %v675_v45 = vsel %vm617_vm9, %v1307_v41, %v673_v38 }
 0x101   : > { %v436_v47 = vpop.permute.xlu0 %435  ;;  %v620_v48 = vpack.c.bf16 %v618_v44, %v618_v44  ;;  %v678_v49 = vpack.c.bf16 %v675_v45, %v675_v45 }
 0x102   : > { %v442_v50 = vsel %vm441_vm7, %v436_v47, %v439_v46 }
 0x103   : > { %v445_v51 = vsel %vm412_vm8, %v442_v50, 0.0  ;;  %v625_v52 = vsel %vm473_vm0, %v620_v48, 0  ;;  %v683_v53 = vsel %vm473_vm0, %v678_v49, 0 }
 0x104   : > { %1218 = vmatpush3.bf16.msra.mxu1 %v625_v52  ;;  %1224 = vmatpush3.bf16.msra.mxu0 %v683_v53  ;;  %v1310_v63 = vpop.permute.xlu1 %1309 }
 0x105   : > { %v728_v56 = vpop.permute.xlu0 %727  ;;  %1229 = vmatprep.subr.bf16.mxu1 %v1369_v0  ;;  %1235 = vmatprep.subr.bf16.mxu0 %v1369_v0  ;;  %v1312_v1 = vunpack.i.h.bf16 %v1310_v63  ;;  %v1311_v2 = vunpack.i.l.bf16 %v1310_v63 }
 0x106   : > { %v730_v57 = vsel %vm617_vm9, %v445_v51, %v728_v56 }
 0x107   : > { %v733_v58 = vpack.c.bf16 %v730_v57, %v730_v57  ;;  %1220 = vmatmul.mubr.msk.bf16.vlgmr.msra.gmra.mxu1 %vm469_vm2, %v619_v54  ;;  %1226 = vmatmul.mubr.msk.bf16.vlgmr.msra.gmra.mxu0 %vm469_vm2, %v1167_v55  ;;  %v789_v6 = vsel %vm788_vm10, %v1311_v2, %v1312_v1 }
 0x108   : > { %1231 = vmatprep.mubr.msk.bf16.mxu1 %vm1372_vm1, %v1369_v0  ;;  %1237 = vmatprep.mubr.msk.bf16.mxu0 %vm1372_vm1, %v1369_v0  ;;  %v1320_v7 = vpop.permute.xlu1 %1319  ;;  %v792_v8 = vpack.c.bf16 %v789_v6, %v789_v6 }
 0x109   : > { %v738_v59 = vsel %vm473_vm0, %v733_v58, 0  ;;  %v1315_v60 = vpop.permute.xlu0 %1314  ;;  %v1322_v10 = vunpack.i.h.bf16 %v1320_v7  ;;  %v1321_v11 = vunpack.i.l.bf16 %v1320_v7 }
 0x10a   : > { %1230 = vmatpush3.bf16.msra.mxu1 %v738_v59  ;;  %v1317_v61 = vunpack.i.h.bf16 %v1315_v60  ;;  %v1316_v62 = vunpack.i.l.bf16 %v1315_v60  ;;  %v797_v12 = vsel %vm473_vm0, %v792_v8, 0 }
 0x10b   : > { %1241 = vmatprep.subr.bf16.mxu1 %v1369_v0  ;;  %1236 = vmatpush3.bf16.msra.mxu0 %v797_v12  ;;  %v904_v14 = vsel %vm788_vm10, %v1321_v11, %v1322_v10 }
 0x10c   : > { %v846_v4 = vsel %vm788_vm10, %v1316_v62, %v1317_v61  ;;  %1247 = vmatprep.subr.bf16.mxu0 %v1369_v0  ;;  %v907_v15 = vpack.c.bf16 %v904_v14, %v904_v14 }
 0x10d   : > { %v849_v5 = vpack.c.bf16 %v846_v4, %v846_v4 }
 0x10e   : > { %v912_v17 = vsel %vm473_vm0, %v907_v15, 0 }
 0x10f   : > { %1232 = vmatmul.mubr.msk.bf16.vlgmr.msra.gmra.mxu1 %vm469_vm2, %v1169_v3  ;;  %v854_v9 = vsel %vm473_vm0, %v849_v5, 0  ;;  %1238 = vmatmul.mubr.msk.bf16.vlgmr.msra.gmra.mxu0 %vm469_vm2, %v1171_v13 }
 0x110   : > { %1242 = vmatpush3.bf16.msra.mxu1 %v854_v9  ;;  %1243 = vmatprep.mubr.msk.bf16.mxu1 %vm1372_vm1, %v1369_v0 }
 0x111   : > { %1248 = vmatpush3.bf16.msra.mxu0 %v912_v17  ;;  %1249 = vmatprep.mubr.msk.bf16.mxu0 %vm1372_vm1, %v1369_v0 }
 0x117   : > { %1244 = vmatmul.mubr.msk.bf16.vlgmr.msra.gmra.mxu1 %vm469_vm2, %v1173_v16  ;;  %1250 = vmatmul.mubr.msk.bf16.vlgmr.msra.gmra.mxu0 %vm469_vm2, %v1175_v18 }
 0x14f   : > { %v557_v19 = vpop.f32.mrf.mxu1 }
 0x150   : > { %v558_v20 = vadd.f32 %v557_v19, %v1534_v32 }
 0x151   : > { %v1209_v21 = vpop.f32.mrf.mxu1 }
 0x153   : > { %v606_v22 = vpop.f32.mrf.mxu0  ;;  %v560_v23 = vpop.f32.mrf.mxu1 }
 0x154   : > { %v612_v24 = vadd.f32 %v606_v22, %v558_v20 }
 0x155   : > { %v1215_v25 = vpop.f32.mrf.mxu0  ;;  %v1210_v26 = vpop.f32.mrf.mxu1 }
 0x157   : > { %v609_v27 = vpop.f32.mrf.mxu0 }
 0x159   : > { %v1216_v28 = vpop.f32.mrf.mxu0 }
 0x1c7   : > { %v661_v0 = vpop.f32.mrf.mxu1  ;;  %v719_v29 = vpop.f32.mrf.mxu0 }
 0x1c8   : > { %v667_v37 = vadd.f32 %v661_v0, %v612_v24 }
 0x1c9   : > { %v1221_v30 = vpop.f32.mrf.mxu1  ;;  %v1227_v31 = vpop.f32.mrf.mxu0 }
 0x1ca   : > { %v725_v39 = vadd.f32 %v719_v29, %v667_v37 }
 0x1cb   : > { %v664_v33 = vpop.f32.mrf.mxu1  ;;  %v722_v34 = vpop.f32.mrf.mxu0 }
 0x1cd   : > { %v1222_v35 = vpop.f32.mrf.mxu1  ;;  %v1228_v36 = vpop.f32.mrf.mxu0 }
 0x1cf   : > { %v774_v38 = vpop.f32.mrf.mxu1  ;;  %v833_v42 = vpop.f32.mrf.mxu0 }
 0x1d0   : > { %v780_v41 = vadd.f32 %v774_v38, %v725_v39 }
 0x1d1   : > { %v1233_v32 = vpop.f32.mrf.mxu1  ;;  %v1239_v44 = vpop.f32.mrf.mxu0 }
 0x1d2   : > { %v839_v46 = vadd.f32 %v833_v42, %v780_v41 }
 0x1d3   : > { %v777_v40 = vpop.f32.mrf.mxu1  ;;  %v836_v47 = vpop.f32.mrf.mxu0 }
 0x1d5   : > { %v1234_v43 = vpop.f32.mrf.mxu1  ;;  %v1240_v50 = vpop.f32.mrf.mxu0 }
 0x1d7   : > { %v890_v45 = vpop.f32.mrf.mxu1  ;;  %v948_v52 = vpop.f32.mrf.mxu0 }
 0x1d8   : > { %v896_v49 = vadd.f32 %v890_v45, %v839_v46 }
 0x1d9   : > { %v1245_v48 = vpop.f32.mrf.mxu1  ;;  %v1251_v55 = vpop.f32.mrf.mxu0 }
 0x1da   : > { %v954_v54 = vadd.f32 %v948_v52, %v896_v49 }
 0x1db   : > { %v893_v51 = vpop.f32.mrf.mxu1  ;;  %v951_v58 = vpop.f32.mrf.mxu0 }
 0x1dc   : > { %v955_v56 = vpack.c.bf16 %v954_v54, %v954_v54  ;;  %957 = vadd.xlane.f32.xlu0 %v954_v54  ;;  %v959_v57 = vmul.f32 %v954_v54, %v954_v54 }
 0x1dd   : > { %v1246_v53 = vpop.f32.mrf.mxu1  ;;  %v1252_v59 = vpop.f32.mrf.mxu0 }
 0x1de   : > { %956 = vst [vmem:[%s372_s15] sm:$0xf] %v955_v56  ;;  %960 = vadd.xlane.f32.xlu1 %v959_v57 }
 0x265   : > { %v958_v60 = vpop.xlane.xlu0 %957 }
 0x267   : > { %v961_v61 = vpop.xlane.xlu1 %960 }
 0x268   : > { %v962_v62 = vsel %vm430_vm5, %v958_v60, %v961_v61 }
 0x269   : > { %964 = vst.msk [vmem:[%s380_s19] sm:$0xff] %vm963_vm11, %v962_v62 }
 0x26a PF: > { %s16_s22 = sadd.s32 1, %s1367_s22   ;;  %s1622_s18 = smov %s1359_s20 }
 0x26b   : > { %p13_p11 = scmp.ge.s32.totalorder %s16_s22, 6   ;;  %s1623_s19 = smov %s1363_s21 }
 0x26c   : > { %s1624_s20 = smov %s1627_s23  ;;  %s1625_s21 = smov %s1631_s24 }
 0x26d   :  { %15 = sbr.rel (!%p13_p11) target bundleno = 3 (0x3), region = 92 }

// kernel: double_conv.3
= control target key start
LH: loop header
LB: loop body
LE: loop exit
PB: predicated region body
PF: predicated region fallthrough
CT: control target
= control target key end

     0   :  { %s1494_s24 = smov 0   ;;  %s1496_s25 = smov 0   ;;  %s1699_s0 = inlined_call_operand.vmem [shape: bf16[2,8,256], index: 0, kind: input, shape index: {}, may-alias: {0,1,2}]   ;;  %s1700_s1 = inlined_call_operand.vmem [shape: bf16[2,8,256], index: 1, kind: input, shape index: {}, may-alias: {0,1,2}]   ;;  %s1701_s2 = inlined_call_operand.vmem [shape: bf16[2,8,256], index: 2, kind: input, shape index: {}, may-alias: {0,1,2}]   ;;  %s1702_s3 = inlined_call_operand.vmem [shape: f32[8,1], index: 3, kind: input, shape index: {}]   ;;  %s1703_s4 = inlined_call_operand.vmem [shape: f32[8,1], index: 4, kind: input, shape index: {}]   ;;  %s1704_s5 = inlined_call_operand.vmem [shape: bf16[9,8,8], index: 5, kind: input, shape index: {}]   ;;  %s1705_s6 = inlined_call_operand.vmem [shape: bf16[2,8,256], index: 6, kind: output, shape index: {0}]   ;;  %s1706_s7 = inlined_call_operand.vmem [shape: f32[2,2,8,2], index: 7, kind: output, shape index: {1}]  }
   0x1   :  { %s1498_s26 = smov 0   ;;  %s1500_s27 = smov 0  }
   0x2   :  { %s1502_s28 = smov 0  }
   0x3 LB: > { %s27_s29 = sadd.s32 1, %s1433_s26  ;;  %s30_s30 = sadd.s32 1, %s1437_s27  ;;  %s1441_s28 = sphi %s1502_s28, %s18_s28   ;;  %s1437_s27 = sphi %s1500_s27, %s1710_s27   ;;  %s1433_s26 = sphi %s1498_s26, %s1709_s26   ;;  %s1429_s25 = sphi %s1496_s25, %s1708_s25   ;;  %s1425_s24 = sphi %s1494_s24, %s1707_s24  }
   0x4   : > { %p28_p0 = scmp.ge.s32.totalorder %s27_s29, 2  ;;  %p1218_p1 = scmp.ge.s32.totalorder %s1441_s28, 1 }
   0x5   : > { %p315_p2 = scmp.lt.s32.totalorder %s1441_s28, 5 }
   0x6   : > { %s1712_s29 = smov (%p28_p0, %s27_s29), 0  ;;  %s1714_s30 = smov (!%p28_p0, %s30_s30), %s1437_s27 }
   0x7   : > { %p316_p3 = pnand %p1218_p1, %p315_p2  ;;  %p32_p4 = scmp.ge.s32.totalorder %s1714_s30, 2 }
   0x8   : > { %s405_s12 = sadd.s32 (!%p316_p3), 1, %s1425_s24  ;;  %p383_p5 = scmp.lt.s32.totalorder (!%p316_p3), %s1429_s25, 1 }
   0x9   : > { %s1716_s30 = smov (%p32_p4, %s1714_s30), 0  ;;  %319 = sbr.rel (%p316_p3) target bundleno = 745 (0x2e9), region = 44 }
   0xa   : > { %s1221_s13 = sadd.s32 (!%p316_p3), 4294967295, %s1425_s24  ;;  %p406_p6 = scmp.lt.s32.totalorder (!%p316_p3), %s405_s12, 1 }
   0xb   : > { %p385_p7 = scmp.lt.s32.totalorder (!%p316_p3), %s1425_s24, 1  ;;  %p392_p8 = scmp.gt.s32.totalorder (!%p316_p3), %s1221_s13, 0 }
   0xc   : > { %p1222_p9 = scmp.lt.s32.totalorder (!%p316_p3), %s1221_s13, 1  ;;  %p463_p10 = scmp.gt.s32.totalorder (!%p316_p3), %s1425_s24, 0 }
   0xd   : > { %s1448_s21 = smov (!%p316_p3), 127   ;;  %s1449_s22 = smov (!%p316_p3), 15  }
   0xe   : > { %v436_v0 = vld [vmem:[%s1702_s3] sm:$0xff]  ;;  %v1443_v1 = vmov 0   ;;  %v1444_v3 = vmov 0.0   ;;  %s1718_s25 = smov (!%p383_p5, %s1429_s25), 1  ;;  %s1720_s12 = smov (!%p406_p6, %s405_s12), 1  ;;  %vm1445_vm0 = vmmov 0   ;;  %v473_v29 = vlaneseq }
   0xf   : > { %1382 = vset.pattern.permute.xlu0 %v1443_v1  ;;  %v437_v2 = vld [vmem:[%s1703_s4] sm:$0xff]  ;;  %1277 = vmatprep.subr.bf16.mxu0 %v1444_v3  ;;  %s386_s14 = scalar_select %p385_p7, %s1425_s24, 1  ;;  %vm551_vm2 = vcmask 1043456   ;;  %v1239_v26 = vld [vmem:[%s1704_s5 + $0x10] sm:$0xf]  ;;  %vm547_vm3 = vcmask 64512  }
  0x10   : > { %442 = vperm.xlu0 %1382, %v436_v0   ;;  %1283 = vmatprep.subr.bf16.mxu1 %v1444_v3  ;;  %s1722_s13 = smov (!%p392_p8, %s1221_s13), 0  ;;  %s1724_s12 = smov (!%p406_p6, %s1720_s12), 1  ;;  %v1585_v30 = vand.u32 127, %v473_v29  ;;  %v1238_v39 = vld [vmem:[%s1704_s5 + $0xc] sm:$0xf]  ;;  %vm508_vm7 = vcmask 7168  }
  0x11   : > { %s1219_s15 = sshll.u32 %s1718_s25, 1  ;;  %s1726_s13 = smov (!%p1222_p9, %s1722_s13), 1  ;;  %1279 = vmatprep.mubr.msk.bf16.mxu0 %vm1445_vm0, %v1444_v3  ;;  %1285 = vmatprep.mubr.msk.bf16.mxu1 %vm1445_vm0, %v1444_v3  ;;  %v1242_v45 = vld [vmem:[%s1704_s5 + $0x14] sm:$0xf]  ;;  %vm519_vm9 = vcmask 121856   ;;  %vm695_vm11 = vcmask 130048  }
  0x12   : > { %s1540_s16 = sadd.s32 %s1219_s15, %s386_s14  ;;  %s413_s17 = sadd.s32 %s1219_s15, %s1724_s12  ;;  %v479_v31 = vand.u32 15, %v1585_v30  ;;  %vm489_vm8 = vcmp.ge.s32.totalorder %v1585_v30, 1  ;;  %vm490_vm10 = vcmp.le.s32.totalorder %v1585_v30, 14  ;;  %vm866_vm12 = vcmask 916480   ;;  %v1247_v30 = vld [vmem:[%s1704_s5 + $0x8] sm:$0xf] }
  0x13   : > { %s1220_s18 = sshll.u32 %s1540_s16, 2  ;;  %s1233_s19 = sshll.u32 %s413_s17, 2  ;;  %vm1041_vm13 = vcmask 15360  }
  0x14   : > { %448 = vperm.xlu0 %1382, %v437_v2   ;;  %s399_s20 = sadd.s32 %s1726_s13, %s1219_s15  ;;  %s390_s23 = scalar_lea.vmem %s1699_s0, %s1220_s18  ;;  %vm487_vm5 = vcmp.ge.s32.totalorder %v479_v31, 1  ;;  %vm488_vm6 = vcmp.le.s32.totalorder %v479_v31, 14 }
  0x15   : > { %s415_s10 = scalar_lea.vmem %s1701_s2, %s1233_s19  ;;  %s1228_s11 = sshll.u32 %s399_s20, 2  ;;  %v438_v4 = vld [vmem:[%s390_s23] sm:$0xf] }
  0x16   : > { %v458_v5 = vld [vmem:[%s415_s10] sm:$0xf]  ;;  %s401_s12 = scalar_lea.vmem %s1700_s1, %s1228_s11  ;;  %v439_v6 = vunpack.c.l.bf16 %v438_v4  ;;  %s1446_s17 = smov 1  }
  0x17   : > { %v459_v7 = vunpack.c.l.bf16 %v458_v5  ;;  %s469_s13 = scalar_select %p385_p7, 1, 0  ;;  %v453_v9 = vld [vmem:[%s401_s12] sm:$0xf] }
  0x18   : > { %v454_v11 = vunpack.c.l.bf16 %v453_v9  ;;  %s464_s15 = scalar_select %p463_p10, 1, 0 }
  0x19   : > { %v470_v13 = vstv %s469_s13  ;;  %s1447_s24 = smov 113   ;;  %s1450_s23 = smov 17  }
  0x1a   : > { %vm471_vm1 = vcmp.eq.s32.totalorder %v470_v13, 1  ;;  %v465_v25 = vstv %s464_s15  ;;  %s1451_s8 = smov 16   ;;  %s1452_s9 = smov 31  }
  0x1b   : > { %vm466_vm4 = vcmp.eq.s32.totalorder %v465_v25, 1  ;;  %s1453_s12 = smov 112   ;;  %s426_s14 = scalar_lea.vmem %s1705_s6, %s1220_s18 }
  0x8b   : > { %v443_v8 = vpop.permute.xlu0 %442 }
  0x8c   : > { %v445_v10 = vmul.f32 %v443_v8, %v439_v6  ;;  %v460_v12 = vmul.f32 %v459_v7, %v443_v8  ;;  %v455_v17 = vmul.f32 %v454_v11, %v443_v8  ;;  %v697_v11 = vld [vmem:[%s1704_s5] sm:$0xf] }
  0x8f   : > { %v449_v14 = vpop.permute.xlu0 %448 }
  0x90   : > { %v451_v15 = vadd.f32 %v449_v14, %v445_v10  ;;  %v461_v16 = vadd.f32 %v460_v12, %v449_v14  ;;  %v456_v20 = vadd.f32 %v455_v17, %v449_v14  ;;  %v1245_v12 = vld [vmem:[%s1704_s5 + $0x4] sm:$0xf] }
  0x92   : > { %v1561_v18 = vmax.f32 %v451_v15, 0.0  ;;  %v462_v19 = vmax.f32 %v461_v16, 0.0  ;;  %v457_v27 = vmax.f32 %v456_v20, 0.0 }
  0x94   : > { %491 = vrot.lane.b32.xlu1 %v1561_v18, %s1446_s17  ;;  %v1564_v21 = vsel %vm471_vm1, %v462_v19, 0.0  ;;  %v546_v22 = vpack.c.bf16 %v1561_v18, %v1561_v18  ;;  %v467_v28 = vsel %vm466_vm4, %v457_v27, 0.0 }
  0x95   : > { %525 = vrot.lane.b32.xlu0 %v1564_v21, %s1447_s24  ;;  %v1393_v23 = vpack.i.bf16 %v1564_v21, %v1561_v18 }
  0x96   : > { %v553_v24 = vsel %vm551_vm2, %v546_v22, 0 }
  0x97   : > { %1278 = vmatpush3.bf16.msra.mxu0 %v553_v24 }
  0x98   : > { %496 = vrot.lane.b32.xlu1 %v1561_v18, %s1448_s21  ;;  %1289 = vmatprep.subr.bf16.mxu0 %v1444_v3 }
  0x99   : > { %533 = vrot.lane.b32.xlu0 %v1564_v21, %s1448_s21 }
  0x9a   : > { %1280 = vmatmul.mubr.msk.bf16.vlgmr.msra.gmra.mxu0 %vm547_vm3, %v1239_v26 }
  0x9b   : > { %1291 = vmatprep.mubr.msk.bf16.mxu0 %vm1445_vm0, %v1444_v3 }
  0x9c   : > { %528 = vrot.lane.b32.xlu1 %v1564_v21, %s1446_s17 }
  0x9d   : > { %502 = vrot.lane.b32.xlu0 %v467_v28, %s1446_s17 }
  0xa0   : > { %536 = vrot.lane.b32.xlu1 %v1564_v21, %s1449_s22 }
  0xa4   : > { %505 = vrot.lane.b32.xlu1 %v467_v28, %s1450_s23 }
  0xa8   : > { %750 = vrot.lane.b32.xlu1 %v1561_v18, %s1451_s8 }
  0xac   : > { %516 = vrot.lane.b32.xlu1 %v467_v28, %s1452_s9 }
 0x106   : > { %v492_v32 = vpop.permute.xlu1 %491 }
 0x107   : > { %v495_v33 = vsel %vm487_vm5, %v492_v32, 0.0  ;;  %v526_v40 = vpop.permute.xlu0 %525  ;;  %v1249_v32 = vld [vmem:[%s1704_s5 + $0x18] sm:$0xf] }
 0x108   : > { %v1383_v34 = vpack.i.bf16 %v467_v28, %v495_v33  ;;  %v543_v35 = vpack.c.bf16 %v495_v33, %v495_v33 }
 0x10a   : > { %1384 = vrot.lane.b32.xlu0 %v1383_v34, %s1451_s8  ;;  %v497_v36 = vpop.permute.xlu1 %496  ;;  %v599_v37 = vsel %vm551_vm2, %v543_v35, 0 }
 0x10b   : > { %v500_v38 = vsel %vm488_vm6, %v497_v36, 0.0  ;;  %1284 = vmatpush3.bf16.msra.mxu1 %v599_v37  ;;  %v534_v48 = vpop.permute.xlu0 %533 }
 0x10c   : > { %v643_v41 = vpack.c.bf16 %v500_v38, %v500_v38  ;;  %1295 = vmatprep.subr.bf16.mxu1 %v1444_v3 }
 0x10e   : > { %513 = vrot.lane.b32.xlu0 %v467_v28, %s1449_s22  ;;  %v529_v42 = vpop.permute.xlu1 %528  ;;  %v648_v43 = vsel %vm551_vm2, %v643_v41, 0  ;;  %1286 = vmatmul.mubr.msk.bf16.vlgmr.msra.gmra.mxu1 %vm547_vm3, %v1238_v39  ;;  %v1253_v39 = vld [vmem:[%s1704_s5 + $0x20] sm:$0xf] }
 0x10f   : > { %v531_v44 = vsel %vm508_vm7, %v526_v40, %v529_v42  ;;  %1290 = vmatpush3.bf16.msra.mxu0 %v648_v43  ;;  %1297 = vmatprep.mubr.msk.bf16.mxu1 %vm1445_vm0, %v1444_v3  ;;  %v503_v58 = vpop.permute.xlu0 %502 }
 0x110   : > { %v532_v46 = vsel %vm489_vm8, %v531_v44, 0.0  ;;  %1301 = vmatprep.subr.bf16.mxu0 %v1444_v3 }
 0x111   : > { %v1388_v47 = vpack.i.bf16 %v532_v46, %v495_v33 }
 0x112   : > { %805 = vrot.lane.b32.xlu0 %v500_v38, %s1451_s8  ;;  %v537_v49 = vpop.permute.xlu1 %536  ;;  %1292 = vmatmul.mubr.msk.bf16.vlgmr.msra.gmra.mxu0 %vm547_vm3, %v1242_v45 }
 0x113   : > { %v539_v50 = vsel %vm519_vm9, %v534_v48, %v537_v49  ;;  %1389 = vrot.lane.b32.xlu1 %v1388_v47, %s1453_s12  ;;  %1303 = vmatprep.mubr.msk.bf16.mxu0 %vm1445_vm0, %v1444_v3 }
 0x114   : > { %v540_v51 = vsel %vm490_vm10, %v539_v50, 0.0 }
 0x115   : > { %v1398_v52 = vpack.i.bf16 %v540_v51, %v500_v38  ;;  %v1251_v38 = vld [vmem:[%s1704_s5 + $0x1c] sm:$0xf] }
 0x116   : > { %1394 = vrot.lane.b32.xlu0 %v1393_v23, %s1453_s12  ;;  %v506_v57 = vpop.permute.xlu1 %505 }
 0x117   : > { %1399 = vrot.lane.b32.xlu1 %v1398_v52, %s1453_s12  ;;  %v509_v60 = vsel %vm508_vm7, %v503_v58, %v506_v57  ;;  %s1237_s12 = sshll.u32 %s1540_s16, 3 }
 0x118   : > { %v512_v0 = vsel %vm489_vm8, %v509_v60, 0.0  ;;  %s434_s17 = scalar_lea.vmem %s1706_s7, %s1237_s12 }
 0x11a   : > { %v751_v59 = vpop.permute.xlu1 %750 }
 0x11e   : > { %v517_v4 = vpop.permute.xlu1 %516 }
 0x15a   : > { %v1617_v53 = vpop.f32.mrf.mxu0 }
 0x15c   : > { %v1281_v54 = vpop.f32.mrf.mxu0 }
 0x15e   : > { %v592_v55 = vpop.f32.mrf.mxu0 }
 0x160   : > { %v1282_v56 = vpop.f32.mrf.mxu0 }
 0x17c   : > { %v1385_v61 = vpop.permute.xlu0 %1384 }
 0x17d   : > { %v1387_v62 = vunpack.i.h.bf16 %v1385_v61  ;;  %v1386_v63 = vunpack.i.l.bf16 %v1385_v61 }
 0x17f   : > { %v696_v1 = vsel %vm695_vm11, %v512_v0, %v1386_v63  ;;  %v753_v2 = vsel %vm695_vm11, %v1387_v62, %v751_v59 }
 0x180   : > { %v514_v5 = vpop.permute.xlu0 %513  ;;  %v698_v6 = vpack.c.bf16 %v696_v1, %v696_v1  ;;  %v756_v7 = vpack.c.bf16 %v753_v2, %v753_v2 }
 0x181   : > { %v520_v8 = vsel %vm519_vm9, %v514_v5, %v517_v4 }
 0x182   : > { %v703_v9 = vsel %vm551_vm2, %v698_v6, 0  ;;  %v761_v10 = vsel %vm551_vm2, %v756_v7, 0  ;;  %v523_v13 = vsel %vm490_vm10, %v520_v8, 0.0 }
 0x183   : > { %1296 = vmatpush3.bf16.msra.mxu1 %v703_v9  ;;  %1302 = vmatpush3.bf16.msra.mxu0 %v761_v10 }
 0x184   : > { %v806_v14 = vpop.permute.xlu0 %805  ;;  %1307 = vmatprep.subr.bf16.mxu1 %v1444_v3  ;;  %1313 = vmatprep.subr.bf16.mxu0 %v1444_v3 }
 0x185   : > { %v808_v15 = vsel %vm695_vm11, %v523_v13, %v806_v14  ;;  %v1390_v16 = vpop.permute.xlu1 %1389 }
 0x186   : > { %v811_v17 = vpack.c.bf16 %v808_v15, %v808_v15  ;;  %v1392_v18 = vunpack.i.h.bf16 %v1390_v16  ;;  %v1391_v19 = vunpack.i.l.bf16 %v1390_v16  ;;  %1298 = vmatmul.mubr.msk.bf16.vlgmr.msra.gmra.mxu1 %vm547_vm3, %v697_v11  ;;  %1304 = vmatmul.mubr.msk.bf16.vlgmr.msra.gmra.mxu0 %vm547_vm3, %v1245_v12 }
 0x187   : > { %1309 = vmatprep.mubr.msk.bf16.mxu1 %vm1445_vm0, %v1444_v3  ;;  %1315 = vmatprep.mubr.msk.bf16.mxu0 %vm1445_vm0, %v1444_v3 }
 0x188   : > { %v1395_v20 = vpop.permute.xlu0 %1394  ;;  %v816_v21 = vsel %vm551_vm2, %v811_v17, 0  ;;  %v867_v22 = vsel %vm866_vm12, %v1391_v19, %v1392_v18 }
 0x189   : > { %v1397_v23 = vunpack.i.h.bf16 %v1395_v20  ;;  %v1396_v24 = vunpack.i.l.bf16 %v1395_v20  ;;  %1308 = vmatpush3.bf16.msra.mxu1 %v816_v21  ;;  %v1400_v25 = vpop.permute.xlu1 %1399  ;;  %v870_v26 = vpack.c.bf16 %v867_v22, %v867_v22 }
 0x18a   : > { %v1402_v27 = vunpack.i.h.bf16 %v1400_v25  ;;  %v1401_v28 = vunpack.i.l.bf16 %v1400_v25  ;;  %1319 = vmatprep.subr.bf16.mxu1 %v1444_v3 }
 0x18b   : > { %v875_v29 = vsel %vm551_vm2, %v870_v26, 0  ;;  %v924_v31 = vsel %vm866_vm12, %v1396_v24, %v1397_v23 }
 0x18c   : > { %1314 = vmatpush3.bf16.msra.mxu0 %v875_v29  ;;  %v927_v33 = vpack.c.bf16 %v924_v31, %v924_v31  ;;  %v982_v34 = vsel %vm866_vm12, %v1401_v28, %v1402_v27 }
 0x18d   : > { %1325 = vmatprep.subr.bf16.mxu0 %v1444_v3  ;;  %v985_v35 = vpack.c.bf16 %v982_v34, %v982_v34 }
 0x18e   : > { %1310 = vmatmul.mubr.msk.bf16.vlgmr.msra.gmra.mxu1 %vm547_vm3, %v1247_v30  ;;  %v932_v36 = vsel %vm551_vm2, %v927_v33, 0 }
 0x18f   : > { %1316 = vmatmul.mubr.msk.bf16.vlgmr.msra.gmra.mxu0 %vm547_vm3, %v1249_v32  ;;  %1320 = vmatpush3.bf16.msra.mxu1 %v932_v36  ;;  %v990_v37 = vsel %vm551_vm2, %v985_v35, 0 }
 0x190   : > { %1326 = vmatpush3.bf16.msra.mxu0 %v990_v37  ;;  %1321 = vmatprep.mubr.msk.bf16.mxu1 %vm1445_vm0, %v1444_v3 }
 0x191   : > { %1327 = vmatprep.mubr.msk.bf16.mxu0 %vm1445_vm0, %v1444_v3 }
 0x196   : > { %1322 = vmatmul.mubr.msk.bf16.vlgmr.msra.gmra.mxu1 %vm547_vm3, %v1251_v38 }
 0x197   : > { %1328 = vmatmul.mubr.msk.bf16.vlgmr.msra.gmra.mxu0 %vm547_vm3, %v1253_v39 }
 0x1ce   : > { %v635_v40 = vpop.f32.mrf.mxu1 }
 0x1cf   : > { %v636_v41 = vadd.f32 %v635_v40, %v1617_v53 }
 0x1d0   : > { %v1287_v42 = vpop.f32.mrf.mxu1 }
 0x1d2   : > { %v684_v43 = vpop.f32.mrf.mxu0  ;;  %v638_v44 = vpop.f32.mrf.mxu1 }
 0x1d3   : > { %v690_v45 = vadd.f32 %v684_v43, %v636_v41 }
 0x1d4   : > { %v1293_v3 = vpop.f32.mrf.mxu0  ;;  %v1288_v46 = vpop.f32.mrf.mxu1 }
 0x1d6   : > { %v687_v47 = vpop.f32.mrf.mxu0 }
 0x1d8   : > { %v1294_v48 = vpop.f32.mrf.mxu0 }
 0x246   : > { %v739_v49 = vpop.f32.mrf.mxu1  ;;  %v797_v50 = vpop.f32.mrf.mxu0 }
 0x247   : > { %v745_v56 = vadd.f32 %v739_v49, %v690_v45 }
 0x248   : > { %v1299_v51 = vpop.f32.mrf.mxu1  ;;  %v1305_v52 = vpop.f32.mrf.mxu0 }
 0x249   : > { %v803_v60 = vadd.f32 %v797_v50, %v745_v56 }
 0x24a   : > { %v742_v54 = vpop.f32.mrf.mxu1  ;;  %v800_v55 = vpop.f32.mrf.mxu0 }
 0x24c   : > { %v1300_v57 = vpop.f32.mrf.mxu1  ;;  %v1306_v58 = vpop.f32.mrf.mxu0 }
 0x24e   : > { %v852_v59 = vpop.f32.mrf.mxu1 }
 0x24f   : > { %v911_v53 = vpop.f32.mrf.mxu0  ;;  %v858_v62 = vadd.f32 %v852_v59, %v803_v60 }
 0x250   : > { %v1311_v61 = vpop.f32.mrf.mxu1 }
 0x251   : > { %v1317_v63 = vpop.f32.mrf.mxu0  ;;  %v917_v4 = vadd.f32 %v911_v53, %v858_v62 }
 0x252   : > { %v855_v0 = vpop.f32.mrf.mxu1 }
 0x253   : > { %v914_v1 = vpop.f32.mrf.mxu0 }
 0x254   : > { %v1312_v2 = vpop.f32.mrf.mxu1 }
 0x255   : > { %v1318_v5 = vpop.f32.mrf.mxu0 }
 0x256   : > { %v968_v6 = vpop.f32.mrf.mxu1 }
 0x257   : > { %v974_v7 = vadd.f32 %v968_v6, %v917_v4  ;;  %v1026_v8 = vpop.f32.mrf.mxu0 }
 0x258   : > { %v1323_v9 = vpop.f32.mrf.mxu1 }
 0x259   : > { %v1032_v10 = vadd.f32 %v1026_v8, %v974_v7  ;;  %v1329_v11 = vpop.f32.mrf.mxu0 }
 0x25a   : > { %v971_v12 = vpop.f32.mrf.mxu1 }
 0x25b   : > { %v1033_v13 = vpack.c.bf16 %v1032_v10, %v1032_v10  ;;  %1035 = vadd.xlane.f32.xlu0 %v1032_v10  ;;  %v1029_v14 = vpop.f32.mrf.mxu0  ;;  %v1037_v15 = vmul.f32 %v1032_v10, %v1032_v10 }
 0x25c   : > { %v1324_v16 = vpop.f32.mrf.mxu1 }
 0x25d   : > { %1034 = vst [vmem:[%s426_s14] sm:$0xf] %v1033_v13  ;;  %1038 = vadd.xlane.f32.xlu1 %v1037_v15  ;;  %v1330_v17 = vpop.f32.mrf.mxu0 }
 0x2e4   : > { %v1036_v18 = vpop.xlane.xlu0 %1035 }
 0x2e6   : > { %v1039_v19 = vpop.xlane.xlu1 %1038 }
 0x2e7   : > { %v1040_v20 = vsel %vm508_vm7, %v1036_v18, %v1039_v19 }
 0x2e8   : > { %1042 = vst.msk [vmem:[%s434_s17] sm:$0xff] %vm1041_vm13, %v1040_v20 }
 0x2e9 PF: > { %s18_s28 = sadd.s32 1, %s1441_s28   ;;  %s1707_s24 = smov %s1433_s26 }
 0x2ea   : > { %p15_p11 = scmp.ge.s32.totalorder %s18_s28, 6   ;;  %s1708_s25 = smov %s1437_s27 }
 0x2eb   : > { %s1709_s26 = smov %s1712_s29  ;;  %s1710_s27 = smov %s1716_s30 }
 0x2ec   :  { %17 = sbr.rel (!%p15_p11) target bundleno = 3 (0x3), region = 100 }

</bundles_post_ra>
